<compile_context>
chip_gen: v7x
topology: tpu7x:2x2x1
jax: 0.10.0
libtpu: 0.0.40
codegen_flags: <defaults>
</compile_context>

<pallas_src>
import functools

import jax
import jax.numpy as jnp
from jax import lax
from jax.experimental import pallas as pl
from jax.experimental.pallas import tpu as pltpu

_LANE = 128   # TPU lane width (last dim)


def _round_up(x, m):
    return ((x + m - 1) // m) * m


def _pad2d(a, rows, cols):
    return jnp.pad(a, ((0, rows - a.shape[0]), (0, cols - a.shape[1])))


def _vmem_limit_bytes():
    """~85% of physical VMEM of the attached TPU generation (headroom for compiler scratch)."""
    try:
        cap = int(pltpu.get_tpu_info().vmem_capacity_bytes)
        return int(cap * 0.85)
    except Exception:
        return None   # fall back to Mosaic's default scoped-VMEM limit


def _masked_log_softmax(o, valid_out_dim):
    """Row-wise log-softmax over the first `valid_out_dim` lanes; padded lanes -> 0."""
    col = lax.broadcasted_iota(jnp.int32, o.shape, 1)
    valid = col < valid_out_dim
    om = jnp.where(valid, o, -jnp.inf)
    m = jnp.max(om, axis=-1, keepdims=True)
    lse = jnp.log(jnp.sum(jnp.exp(om - m), axis=-1, keepdims=True)) + m
    return jnp.where(valid, om - lse, 0.0)


# ---------------------------------------------------------------------------
# Fused path: all GINConv layers in one pallas_call (graph resident in VMEM).
# ---------------------------------------------------------------------------
def _gin_fused_kernel(adj_t_ref, x_ref, *refs, num_layers, eps, valid_out_dim,
                      apply_log_softmax):
    """refs = (w1_0, b1_0, w2_0, b2_0, ..., w1_{L-1}, b1_{L-1}, w2_{L-1}, b2_{L-1}, out_ref)."""
    out_ref = refs[-1]
    params = refs[:-1]

    adj_t = adj_t_ref[...]            # bf16 (0/1 exact) -- NO f32 upcast, single VMEM copy
    x = x_ref[...]                    # f32 activations

    # Contract dim 0 of adj_t with dim 0 of x:  adj_t^T @ x == A @ x.
    dn = (((0,), (0,)), ((), ()))

    o = None
    for i in range(num_layers):
        w1 = params[4 * i + 0][...]   # bf16
        b1 = params[4 * i + 1][...]   # f32
        w2 = params[4 * i + 2][...]   # bf16
        b2 = params[4 * i + 3][...]   # f32

        # bf16 x bf16 -> f32 accumulation on the MXU.
        agg = lax.dot_general(adj_t, x.astype(adj_t.dtype), dn,
                              preferred_element_type=jnp.float32)
        h = (1.0 + eps) * x + agg                                        # GIN aggregate (f32)
        h1 = jnp.dot(h.astype(jnp.bfloat16), w1,
                     preferred_element_type=jnp.float32) + b1            # Linear 1
        h1 = jnp.maximum(h1, 0.0)                                        # MLP ReLU
        o = jnp.dot(h1.astype(jnp.bfloat16), w2,
                    preferred_element_type=jnp.float32) + b2             # Linear 2
        if i < num_layers - 1:
            x = jnp.maximum(o, 0.0)   # inter-layer F.relu; dropout = identity (eval)

    if apply_log_softmax:
        o = _masked_log_softmax(o, valid_out_dim)
    out_ref[...] = o


# ---------------------------------------------------------------------------
# Tiled path: one pallas_call per GINConv layer, 2-D grid
#   axis 0: output row tiles ("parallel"  -> megacore sharding on v7x)
#   axis 1: reduction tiles  ("arbitrary" -> f32 VMEM accumulator, P3 pattern)
# ---------------------------------------------------------------------------
def _gin_layer_tiled_kernel(adj_t_ref, x_self_ref, x_agg_ref, w1_ref, b1_ref,
                            w2_ref, b2_ref, out_ref, acc_ref, *,
                            eps, apply_inter_relu, apply_log_softmax,
                            valid_out_dim):
    k = pl.program_id(1)

    @pl.when(k == 0)
    def _():
        acc_ref[...] = (1.0 + eps) * x_self_ref[...]

    # adj_t tile is (tk, tm): contract its dim 0 against the aggregated rows.
    acc_ref[...] += lax.dot_general(
        adj_t_ref[...], x_agg_ref[...].astype(adj_t_ref.dtype),
        (((0,), (0,)), ((), ())), preferred_element_type=jnp.float32)

    @pl.when(k == pl.num_programs(1) - 1)
    def _():
        h = acc_ref[...]
        h1 = jnp.dot(h.astype(jnp.bfloat16), w1_ref[...],
                     preferred_element_type=jnp.float32) + b1_ref[...]
        h1 = jnp.maximum(h1, 0.0)
        o = jnp.dot(h1.astype(jnp.bfloat16), w2_ref[...],
                    preferred_element_type=jnp.float32) + b2_ref[...]
        if apply_inter_relu:
            o = jnp.maximum(o, 0.0)
        if apply_log_softmax:
            o = _masked_log_softmax(o, valid_out_dim)
        out_ref[...] = o


def gin_forward(params, x, adj_t, *, eps=0.0, return_embeds=False,
                assume_binary_adjacency=True, force_tiled=False, tile=None):
    """Pallas GIN forward.

    params: list of (w1, b1, w2, b2) per GINConv layer; x: [N, F]; adj_t: [N, N].
    assume_binary_adjacency: stream adjacency as bf16 (exact for 0/1 entries);
      set False for weighted / normalized adjacencies (kept f32).
    """
    n, in_dim = x.shape
    num_layers = len(params)
    out_dim = params[-1][2].shape[1]

    adj_dtype = jnp.bfloat16 if assume_binary_adjacency else jnp.float32
    vmem_limit = _vmem_limit_bytes()
    budget = vmem_limit if vmem_limit is not None else 32 * 1024 * 1024

    in_pad = _round_up(in_dim, _LANE)
    out_pad = _round_up(out_dim, _LANE)

    # Pad + cast parameters once (shared by both paths): weights bf16, biases f32.
    flat, layer_dims = [], []
    for (w1, b1, w2, b2) in params:
        ci, hdim = w1.shape
        co = w2.shape[1]
        ci_p = _round_up(ci, _LANE)
        h_p = _round_up(hdim, _LANE)
        co_p = _round_up(co, _LANE)
        layer_dims.append((ci_p, h_p, co_p))
        flat += [_pad2d(w1, ci_p, h_p).astype(jnp.bfloat16),
                 _pad2d(b1.reshape(1, -1), 1, h_p).astype(jnp.float32),
                 _pad2d(w2, h_p, co_p).astype(jnp.bfloat16),
                 _pad2d(b2.reshape(1, -1), 1, co_p).astype(jnp.float32)]
    weight_bytes = sum(int(a.size) * a.dtype.itemsize for a in flat)

    # ---- fused-residency estimate: adj + x + out + weights + live intermediates ----
    n_pad = _round_up(n, _LANE)
    max_w = max([in_pad, out_pad] + [d for dims in layer_dims for d in dims])
    fused_bytes = (n_pad * n_pad * jnp.dtype(adj_dtype).itemsize
                   + n_pad * in_pad * 4 + n_pad * out_pad * 4
                   + weight_bytes
                   + 6 * n_pad * max_w * 4)          # headroom for live intermediates
    use_fused = (not force_tiled) and fused_bytes <= int(budget * 0.8)

    if use_fused:
        # -------- single fused pallas_call: adjacency DMA'd from HBM exactly once --------
        x_p = _pad2d(x, n_pad, in_pad).astype(jnp.float32)
        adj_p = _pad2d(adj_t, n_pad, n_pad).astype(adj_dtype)

        kernel = functools.partial(
            _gin_fused_kernel, num_layers=num_layers, eps=eps,
            valid_out_dim=out_dim, apply_log_softmax=not return_embeds)

        flops, feat = 0, in_pad
        for (ci_p, h_p, co_p) in layer_dims:
            flops += 2 * n_pad * n_pad * feat + 2 * n_pad * feat * h_p + 2 * n_pad * h_p * co_p
            feat = co_p
        bytes_accessed = (adj_p.size * adj_p.dtype.itemsize + x_p.size * 4
                          + weight_bytes + n_pad * out_pad * 4)
        transcendentals = 0 if return_embeds else n_pad * (out_pad + 1)   # exp + per-row log

        vmem_spec = pl.BlockSpec(memory_space=pltpu.MemorySpace.VMEM)
        out_p = pl.pallas_call(
            kernel,
            out_shape=jax.ShapeDtypeStruct((n_pad, out_pad), jnp.float32),
            in_specs=[vmem_spec] * (2 + len(flat)),
            out_specs=vmem_spec,
            compiler_params=pltpu.CompilerParams(vmem_limit_bytes=vmem_limit),
            cost_estimate=pl.CostEstimate(flops=int(flops),
                                          transcendentals=int(transcendentals),
                                          bytes_accessed=int(bytes_accessed)),
        )(adj_p, x_p, *flat)
        return out_p[:n, :out_dim]

    # -------- tiled per-layer path (no VMEM ceiling; DMA/compute overlap; megacore) --------
    if tile is None:
        tile = 512 if n >= 512 else 256 if n >= 256 else _LANE
    n_pad_t = _round_up(n, tile)
    n_tiles = n_pad_t // tile

    x_cur = _pad2d(x, n_pad_t, in_pad).astype(jnp.float32)
    adj_p = _pad2d(adj_t, n_pad_t, n_pad_t).astype(adj_dtype)

    for li, (ci_p, h_p, co_p) in enumerate(layer_dims):
        w1, b1, w2, b2 = flat[4 * li: 4 * li + 4]
        is_last = li == num_layers - 1
        kernel = functools.partial(
            _gin_layer_tiled_kernel, eps=eps,
            apply_inter_relu=not is_last,
            apply_log_softmax=(is_last and not return_embeds),
            valid_out_dim=out_dim)

        flops = (2 * n_pad_t * n_pad_t * ci_p
                 + 2 * n_pad_t * ci_p * h_p + 2 * n_pad_t * h_p * co_p)
        bytes_accessed = (adj_p.size * adj_p.dtype.itemsize + 2 * x_cur.size * 4
                          + w1.size * 2 + b1.size * 4 + w2.size * 2 + b2.size * 4
                          + n_pad_t * co_p * 4)
        transcendentals = n_pad_t * (co_p + 1) if (is_last and not return_embeds) else 0

        x_cur = pl.pallas_call(
            kernel,
            out_shape=jax.ShapeDtypeStruct((n_pad_t, co_p), jnp.float32),
            grid=(n_tiles, n_tiles),
            in_specs=[
                pl.BlockSpec((tile, tile), lambda i, k: (k, i)),   # adj_t tile (rows=k, cols=i)
                pl.BlockSpec((tile, ci_p), lambda i, k: (i, 0)),   # x rows for the self term
                pl.BlockSpec((tile, ci_p), lambda i, k: (k, 0)),   # x rows being aggregated
                pl.BlockSpec((ci_p, h_p), lambda i, k: (0, 0)),    # w1 (bf16)
                pl.BlockSpec((1, h_p), lambda i, k: (0, 0)),       # b1 (f32)
                pl.BlockSpec((h_p, co_p), lambda i, k: (0, 0)),    # w2 (bf16)
                pl.BlockSpec((1, co_p), lambda i, k: (0, 0)),      # b2 (f32)
            ],
            out_specs=pl.BlockSpec((tile, co_p), lambda i, k: (i, 0)),
            scratch_shapes=[pltpu.VMEM((tile, ci_p), jnp.float32)],
            compiler_params=pltpu.CompilerParams(
                dimension_semantics=("parallel", "arbitrary"),
                vmem_limit_bytes=vmem_limit),
            cost_estimate=pl.CostEstimate(flops=int(flops),
                                          transcendentals=int(transcendentals),
                                          bytes_accessed=int(bytes_accessed)),
        )(adj_p, x_cur, x_cur, w1, b1, w2, b2)

    return x_cur[:n, :out_dim]


def init_gin_params(key, input_dim, mlp_hidden_dim, hidden_dim, output_dim,
                    num_layers):
    """Deterministic synthetic init. Per layer: (W1[in,h], b1[1,h], W2[h,out], b2[1,out])."""
    params = []
    for i in range(num_layers):
        cin = input_dim if i == 0 else hidden_dim
        cout = output_dim if i == num_layers - 1 else hidden_dim
        key, k1, k2, k3, k4 = jax.random.split(key, 5)
        w1 = 0.5 * jax.random.normal(k1, (cin, mlp_hidden_dim), jnp.float32) / jnp.sqrt(cin * 1.0)
        b1 = 0.01 * jax.random.normal(k2, (1, mlp_hidden_dim), jnp.float32)
        w2 = 0.5 * jax.random.normal(k3, (mlp_hidden_dim, cout), jnp.float32) / jnp.sqrt(mlp_hidden_dim * 1.0)
        b2 = 0.01 * jax.random.normal(k4, (1, cout), jnp.float32)
        params.append((w1, b1, w2, b2))
    return params


def gin_forward_ref(params, x, adj_t, *, eps=0.0, return_embeds=False,
                    mixed_precision=False):
    """Pure-JAX reference.  mixed_precision=True mirrors the kernel's bf16-input /
    f32-accumulate matmuls exactly (adjacency, activations and weights cast to bf16)."""
    def cast(a):
        return a.astype(jnp.bfloat16) if mixed_precision else a

    dn = (((0,), (0,)), ((), ()))          # adj_t^T @ x without materializing the transpose
    adj_c = cast(adj_t)

    def conv(x, w1, b1, w2, b2):
        agg = lax.dot_general(adj_c, cast(x), dn, preferred_element_type=jnp.float32)
        h = (1.0 + eps) * x + agg
        h1 = jnp.maximum(jnp.dot(cast(h), cast(w1),
                                 preferred_element_type=jnp.float32) + b1, 0.0)
        return jnp.dot(cast(h1), cast(w2), preferred_element_type=jnp.float32) + b2

    for p in params[:-1]:
        x = jnp.maximum(conv(x, *p), 0.0)
    out = conv(x, *params[-1])
    if not return_embeds:
        out = jax.nn.log_softmax(out, axis=1)
    return out


if __name__ == "__main__":
    INPUT_DIM = 12
    MLP_HIDDEN = 32
    HIDDEN_DIM = 32
    OUTPUT_DIM = 7
    NUM_LAYERS = 3

    key = jax.random.PRNGKey(0)
    key, kx, ka, kp = jax.random.split(key, 4)
    params = init_gin_params(kp, INPUT_DIM, MLP_HIDDEN, HIDDEN_DIM, OUTPUT_DIM,
                             NUM_LAYERS)

    def check(out, x, adj_t, n):
        assert out.shape == (n, OUTPUT_DIM)
        assert bool(jnp.all(jnp.isfinite(out))), "non-finite values in kernel output"
        ref_mp = gin_forward_ref(params, x, adj_t, mixed_precision=True)
        ref_f32 = gin_forward_ref(params, x, adj_t, mixed_precision=False)
        d_mp = float(jnp.max(jnp.abs(out - ref_mp)))
        d_f32 = float(jnp.max(jnp.abs(out - ref_f32)))
        # Tight vs matched (bf16-input) reference; looser sanity vs full-f32 reference.
        assert jnp.allclose(out, ref_mp, atol=2e-3, rtol=2e-3), \
            f"mismatch vs matched-precision reference, max abs diff = {d_mp}"
        assert jnp.allclose(out, ref_f32, atol=5e-2, rtol=5e-2), \
            f"mismatch vs f32 reference, max abs diff = {d_f32}"

    # --- fused single-kernel path (small graph, fits VMEM) ---
    N = 50
    x = jax.random.normal(kx, (N, INPUT_DIM), jnp.float32)
    adj_t = (jax.random.uniform(ka, (N, N)) < 0.1).astype(jnp.float32)
    out = jax.block_until_ready(gin_forward(params, x, adj_t, return_embeds=False))
    check(out, x, adj_t, N)

    # --- tiled per-layer path (forced), exercises the 2x2 row/reduction grid ---
    N2 = 200
    key, kx2, ka2 = jax.random.split(key, 3)
    x2 = jax.random.normal(kx2, (N2, INPUT_DIM), jnp.float32)
    adj_t2 = (jax.random.uniform(ka2, (N2, N2)) < 0.05).astype(jnp.float32)
    out2 = jax.block_until_ready(
        gin_forward(params, x2, adj_t2, return_embeds=False,
                    force_tiled=True, tile=128))
    check(out2, x2, adj_t2, N2)

    print("KERNEL_OK")
</pallas_src>

<mosaic_0001>
module attributes {stable_mosaic.version = 11 : i64} {
  func.func @_gin_fused_kernel(%arg0: memref<128x128xbf16, #tpu.memory_space<vmem>>, %arg1: memref<128x128xf32, #tpu.memory_space<vmem>>, %arg2: memref<128x128xbf16, #tpu.memory_space<vmem>>, %arg3: memref<1x128xf32, #tpu.memory_space<vmem>>, %arg4: memref<128x128xbf16, #tpu.memory_space<vmem>>, %arg5: memref<1x128xf32, #tpu.memory_space<vmem>>, %arg6: memref<128x128xbf16, #tpu.memory_space<vmem>>, %arg7: memref<1x128xf32, #tpu.memory_space<vmem>>, %arg8: memref<128x128xbf16, #tpu.memory_space<vmem>>, %arg9: memref<1x128xf32, #tpu.memory_space<vmem>>, %arg10: memref<128x128xbf16, #tpu.memory_space<vmem>>, %arg11: memref<1x128xf32, #tpu.memory_space<vmem>>, %arg12: memref<128x128xbf16, #tpu.memory_space<vmem>>, %arg13: memref<1x128xf32, #tpu.memory_space<vmem>>, %arg14: memref<128x128xf32, #tpu.memory_space<vmem>>) attributes {dimension_semantics = [], scalar_prefetch = 0 : i64, scratch_operands = 0 : i64, tpu.core_type = #tpu.core_type<tc>} {
    %c0 = arith.constant 0 : index
    %c0_0 = arith.constant 0 : index
    %0 = vector.load %arg0[%c0, %c0_0] : memref<128x128xbf16, #tpu.memory_space<vmem>>, vector<128x128xbf16>
    %c0_1 = arith.constant 0 : index
    %c0_2 = arith.constant 0 : index
    %1 = vector.load %arg1[%c0_1, %c0_2] : memref<128x128xf32, #tpu.memory_space<vmem>>, vector<128x128xf32>
    %c0_3 = arith.constant 0 : index
    %c0_4 = arith.constant 0 : index
    %2 = vector.load %arg2[%c0_3, %c0_4] : memref<128x128xbf16, #tpu.memory_space<vmem>>, vector<128x128xbf16>
    %c0_5 = arith.constant 0 : index
    %c0_6 = arith.constant 0 : index
    %3 = vector.load %arg3[%c0_5, %c0_6] : memref<1x128xf32, #tpu.memory_space<vmem>>, vector<1x128xf32>
    %c0_7 = arith.constant 0 : index
    %c0_8 = arith.constant 0 : index
    %4 = vector.load %arg4[%c0_7, %c0_8] : memref<128x128xbf16, #tpu.memory_space<vmem>>, vector<128x128xbf16>
    %c0_9 = arith.constant 0 : index
    %c0_10 = arith.constant 0 : index
    %5 = vector.load %arg5[%c0_9, %c0_10] : memref<1x128xf32, #tpu.memory_space<vmem>>, vector<1x128xf32>
    %6 = arith.truncf %1 : vector<128x128xf32> to vector<128x128xbf16>
    %cst = arith.constant dense<0.000000e+00> : vector<128x128xf32>
    %7 = tpu.matmul %0, %6, %cst {dimension_numbers = #tpu.dot_dimension_numbers<[0], [0], [1], [1], [0, 1, 1, 1], [], []>} : vector<128x128xbf16>, vector<128x128xbf16>, vector<128x128xf32> -> vector<128x128xf32>
    %cst_11 = arith.constant 1.000000e+00 : f32
    %8 = vector.broadcast %cst_11 : f32 to vector<128x128xf32>
    %9 = arith.mulf %8, %1 : vector<128x128xf32>
    %10 = arith.addf %9, %7 : vector<128x128xf32>
    %11 = arith.truncf %10 : vector<128x128xf32> to vector<128x128xbf16>
    %cst_12 = arith.constant dense<0.000000e+00> : vector<128x128xf32>
    %12 = tpu.matmul %11, %2, %cst_12 {dimension_numbers = #tpu.dot_dimension_numbers<[1], [0], [0], [1], [0, 0, 1, 1], [], []>} : vector<128x128xbf16>, vector<128x128xbf16>, vector<128x128xf32> -> vector<128x128xf32>
    %13 = vector.broadcast %3 : vector<1x128xf32> to vector<128x128xf32>
    %14 = arith.addf %12, %13 : vector<128x128xf32>
    %cst_13 = arith.constant 0.000000e+00 : f32
    %15 = vector.broadcast %cst_13 : f32 to vector<128x128xf32>
    %16 = arith.maximumf %14, %15 : vector<128x128xf32>
    %17 = arith.truncf %16 : vector<128x128xf32> to vector<128x128xbf16>
    %cst_14 = arith.constant dense<0.000000e+00> : vector<128x128xf32>
    %18 = tpu.matmul %17, %4, %cst_14 {dimension_numbers = #tpu.dot_dimension_numbers<[1], [0], [0], [1], [0, 0, 1, 1], [], []>} : vector<128x128xbf16>, vector<128x128xbf16>, vector<128x128xf32> -> vector<128x128xf32>
    %19 = vector.broadcast %5 : vector<1x128xf32> to vector<128x128xf32>
    %20 = arith.addf %18, %19 : vector<128x128xf32>
    %cst_15 = arith.constant 0.000000e+00 : f32
    %21 = vector.broadcast %cst_15 : f32 to vector<128x128xf32>
    %22 = arith.maximumf %20, %21 : vector<128x128xf32>
    %c0_16 = arith.constant 0 : index
    %c0_17 = arith.constant 0 : index
    %23 = vector.load %arg6[%c0_16, %c0_17] : memref<128x128xbf16, #tpu.memory_space<vmem>>, vector<128x128xbf16>
    %c0_18 = arith.constant 0 : index
    %c0_19 = arith.constant 0 : index
    %24 = vector.load %arg7[%c0_18, %c0_19] : memref<1x128xf32, #tpu.memory_space<vmem>>, vector<1x128xf32>
    %c0_20 = arith.constant 0 : index
    %c0_21 = arith.constant 0 : index
    %25 = vector.load %arg8[%c0_20, %c0_21] : memref<128x128xbf16, #tpu.memory_space<vmem>>, vector<128x128xbf16>
    %c0_22 = arith.constant 0 : index
    %c0_23 = arith.constant 0 : index
    %26 = vector.load %arg9[%c0_22, %c0_23] : memref<1x128xf32, #tpu.memory_space<vmem>>, vector<1x128xf32>
    %27 = arith.truncf %22 : vector<128x128xf32> to vector<128x128xbf16>
    %cst_24 = arith.constant dense<0.000000e+00> : vector<128x128xf32>
    %28 = tpu.matmul %0, %27, %cst_24 {dimension_numbers = #tpu.dot_dimension_numbers<[0], [0], [1], [1], [0, 1, 1, 1], [], []>} : vector<128x128xbf16>, vector<128x128xbf16>, vector<128x128xf32> -> vector<128x128xf32>
    %cst_25 = arith.constant 1.000000e+00 : f32
    %29 = vector.broadcast %cst_25 : f32 to vector<128x128xf32>
    %30 = arith.mulf %29, %22 : vector<128x128xf32>
    %31 = arith.addf %30, %28 : vector<128x128xf32>
    %32 = arith.truncf %31 : vector<128x128xf32> to vector<128x128xbf16>
    %cst_26 = arith.constant dense<0.000000e+00> : vector<128x128xf32>
    %33 = tpu.matmul %32, %23, %cst_26 {dimension_numbers = #tpu.dot_dimension_numbers<[1], [0], [0], [1], [0, 0, 1, 1], [], []>} : vector<128x128xbf16>, vector<128x128xbf16>, vector<128x128xf32> -> vector<128x128xf32>
    %34 = vector.broadcast %24 : vector<1x128xf32> to vector<128x128xf32>
    %35 = arith.addf %33, %34 : vector<128x128xf32>
    %cst_27 = arith.constant 0.000000e+00 : f32
    %36 = vector.broadcast %cst_27 : f32 to vector<128x128xf32>
    %37 = arith.maximumf %35, %36 : vector<128x128xf32>
    %38 = arith.truncf %37 : vector<128x128xf32> to vector<128x128xbf16>
    %cst_28 = arith.constant dense<0.000000e+00> : vector<128x128xf32>
    %39 = tpu.matmul %38, %25, %cst_28 {dimension_numbers = #tpu.dot_dimension_numbers<[1], [0], [0], [1], [0, 0, 1, 1], [], []>} : vector<128x128xbf16>, vector<128x128xbf16>, vector<128x128xf32> -> vector<128x128xf32>
    %40 = vector.broadcast %26 : vector<1x128xf32> to vector<128x128xf32>
    %41 = arith.addf %39, %40 : vector<128x128xf32>
    %cst_29 = arith.constant 0.000000e+00 : f32
    %42 = vector.broadcast %cst_29 : f32 to vector<128x128xf32>
    %43 = arith.maximumf %41, %42 : vector<128x128xf32>
    %c0_30 = arith.constant 0 : index
    %c0_31 = arith.constant 0 : index
    %44 = vector.load %arg10[%c0_30, %c0_31] : memref<128x128xbf16, #tpu.memory_space<vmem>>, vector<128x128xbf16>
    %c0_32 = arith.constant 0 : index
    %c0_33 = arith.constant 0 : index
    %45 = vector.load %arg11[%c0_32, %c0_33] : memref<1x128xf32, #tpu.memory_space<vmem>>, vector<1x128xf32>
    %c0_34 = arith.constant 0 : index
    %c0_35 = arith.constant 0 : index
    %46 = vector.load %arg12[%c0_34, %c0_35] : memref<128x128xbf16, #tpu.memory_space<vmem>>, vector<128x128xbf16>
    %c0_36 = arith.constant 0 : index
    %c0_37 = arith.constant 0 : index
    %47 = vector.load %arg13[%c0_36, %c0_37] : memref<1x128xf32, #tpu.memory_space<vmem>>, vector<1x128xf32>
    %48 = arith.truncf %43 : vector<128x128xf32> to vector<128x128xbf16>
    %cst_38 = arith.constant dense<0.000000e+00> : vector<128x128xf32>
    %49 = tpu.matmul %0, %48, %cst_38 {dimension_numbers = #tpu.dot_dimension_numbers<[0], [0], [1], [1], [0, 1, 1, 1], [], []>} : vector<128x128xbf16>, vector<128x128xbf16>, vector<128x128xf32> -> vector<128x128xf32>
    %cst_39 = arith.constant 1.000000e+00 : f32
    %50 = vector.broadcast %cst_39 : f32 to vector<128x128xf32>
    %51 = arith.mulf %50, %43 : vector<128x128xf32>
    %52 = arith.addf %51, %49 : vector<128x128xf32>
    %53 = arith.truncf %52 : vector<128x128xf32> to vector<128x128xbf16>
    %cst_40 = arith.constant dense<0.000000e+00> : vector<128x128xf32>
    %54 = tpu.matmul %53, %44, %cst_40 {dimension_numbers = #tpu.dot_dimension_numbers<[1], [0], [0], [1], [0, 0, 1, 1], [], []>} : vector<128x128xbf16>, vector<128x128xbf16>, vector<128x128xf32> -> vector<128x128xf32>
    %55 = vector.broadcast %45 : vector<1x128xf32> to vector<128x128xf32>
    %56 = arith.addf %54, %55 : vector<128x128xf32>
    %cst_41 = arith.constant 0.000000e+00 : f32
    %57 = vector.broadcast %cst_41 : f32 to vector<128x128xf32>
    %58 = arith.maximumf %56, %57 : vector<128x128xf32>
    %59 = arith.truncf %58 : vector<128x128xf32> to vector<128x128xbf16>
    %cst_42 = arith.constant dense<0.000000e+00> : vector<128x128xf32>
    %60 = tpu.matmul %59, %46, %cst_42 {dimension_numbers = #tpu.dot_dimension_numbers<[1], [0], [0], [1], [0, 0, 1, 1], [], []>} : vector<128x128xbf16>, vector<128x128xbf16>, vector<128x128xf32> -> vector<128x128xf32>
    %61 = vector.broadcast %47 : vector<1x128xf32> to vector<128x128xf32>
    %62 = arith.addf %60, %61 : vector<128x128xf32>
    %63 = tpu.iota {dimensions = array<i32: 1>} : vector<128x128xi32>
    %c7_i32 = arith.constant 7 : i32
    %64 = vector.broadcast %c7_i32 : i32 to vector<128x128xi32>
    %65 = arith.cmpi slt, %63, %64 : vector<128x128xi32>
    %cst_43 = arith.constant 0xFF800000 : f32
    %66 = vector.broadcast %cst_43 : f32 to vector<128x128xf32>
    %67 = arith.select %65, %62, %66 : vector<128x128xi1>, vector<128x128xf32>
    %cst_44 = arith.constant dense<0xFF800000> : vector<128xf32>
    %68 = vector.multi_reduction <maximumf>, %67, %cst_44 [1] : vector<128x128xf32> to vector<128xf32>
    %69 = vector.shape_cast %68 : vector<128xf32> to vector<128x1xf32>
    %70 = vector.broadcast %69 : vector<128x1xf32> to vector<128x128xf32>
    %71 = arith.subf %67, %70 : vector<128x128xf32>
    %72 = math.exp %71 : vector<128x128xf32>
    %cst_45 = arith.constant dense<0.000000e+00> : vector<128xf32>
    %73 = vector.multi_reduction <add>, %72, %cst_45 [1] : vector<128x128xf32> to vector<128xf32>
    %74 = vector.shape_cast %73 : vector<128xf32> to vector<128x1xf32>
    %75 = math.log %74 : vector<128x1xf32>
    %76 = arith.addf %75, %69 : vector<128x1xf32>
    %77 = vector.broadcast %76 : vector<128x1xf32> to vector<128x128xf32>
    %78 = arith.subf %67, %77 : vector<128x128xf32>
    %cst_46 = arith.constant 0.000000e+00 : f32
    %79 = vector.broadcast %cst_46 : f32 to vector<128x128xf32>
    %80 = arith.select %65, %78, %79 : vector<128x128xi1>, vector<128x128xf32>
    %c0_47 = arith.constant 0 : index
    %c0_48 = arith.constant 0 : index
    %81 = vector.load %arg14[%c0_47, %c0_48] : memref<128x128xf32, #tpu.memory_space<vmem>>, vector<128x128xf32>
    tpu.vector_store %arg14[%c0_47, %c0_48], %80 {strides = array<i32>} : memref<128x128xf32, #tpu.memory_space<vmem>>, vector<128x128xf32>,
    return
  }
}

</mosaic_0001>

<bundles_post_ra>
// kernel: tpu_custom_call.1
= control target key start
LH: loop header
LB: loop body
LE: loop exit
PB: predicated region body
PF: predicated region fallthrough
CT: control target
= control target key end

     0   :  { %19 = vsyncpa [#allocation3], 0  ;;  %s3634_s0 = inlined_call_operand.hbm [shape: bf16[128,128], index: 0, kind: input, shape index: {}]   ;;  %s3635_s1 = inlined_call_operand.hbm [shape: f32[128,128], index: 1, kind: input, shape index: {}]   ;;  %s3636_s2 = inlined_call_operand.hbm [shape: bf16[128,128], index: 2, kind: input, shape index: {}]   ;;  %s3637_s3 = inlined_call_operand.vmem [shape: f32[1,128], index: 3, kind: input, shape index: {}]   ;;  %s3638_s4 = inlined_call_operand.hbm [shape: bf16[128,128], index: 4, kind: input, shape index: {}]   ;;  %s3639_s5 = inlined_call_operand.vmem [shape: f32[1,128], index: 5, kind: input, shape index: {}]   ;;  %s3640_s6 = inlined_call_operand.hbm [shape: bf16[128,128], index: 6, kind: input, shape index: {}]   ;;  %s3641_s7 = inlined_call_operand.vmem [shape: f32[1,128], index: 7, kind: input, shape index: {}]   ;;  %s3642_s8 = inlined_call_operand.hbm [shape: bf16[128,128], index: 8, kind: input, shape index: {}]   ;;  %s3643_s9 = inlined_call_operand.vmem [shape: f32[1,128], index: 9, kind: input, shape index: {}]   ;;  %s3644_s10 = inlined_call_operand.hbm [shape: bf16[128,128], index: 10, kind: input, shape index: {}]   ;;  %s3645_s11 = inlined_call_operand.vmem [shape: f32[1,128], index: 11, kind: input, shape index: {}]   ;;  %s3646_s12 = inlined_call_operand.hbm [shape: bf16[128,128], index: 12, kind: input, shape index: {}]   ;;  %s3647_s13 = inlined_call_operand.vmem [shape: f32[1,128], index: 13, kind: input, shape index: {}]   ;;  %s3648_s14 = inlined_call_operand.hbm [shape: f32[128,128], index: 14, kind: output, shape index: {}]  }
   0x1   :  { %20 = vsyncpa [#allocation6], 0 }
   0x2   :  { %21 = vsyncpa [#allocation9], 0 }
   0x3   :  { %22 = vsyncpa [#allocation12], 0 }
   0x4   :  { %23 = vsyncpa [#allocation15], 0 }
   0x5   :  { %24 = vsyncpa [#allocation4], 0  ;;  %s2854_s29 = smov [#allocation5]   ;;  %s2644_s17 = scalar_lea.hbm %s3635_s1, 2048 }
   0x6   :  { %s42_s30 = sshll.u32 %s2854_s29, 4  ;;  %p2645_p0 = scmp.ne.s32.totalorder %s3635_s1, %s2644_s17  ;;  %s43_s30 = int_to_ptr.vmem [resolvable:$true] %s42_s30 }
   0x7   :  { %p2648_p1 = scmp.lt.u32.totalorder %s2644_s17, %s3635_s1 }
   0x9   :  { %p2650_p2 = pnand %p2648_p1, %p2645_p0 }
   0xb   :  { %2653 = shalt.err (!%p2650_p2)
}
   0xc   :  { %s2654_s22 = scalar_lea.vmem %s43_s30, 2048  ;;  %p2659_p4 = scmp.lt.s32.totalorder %s43_s30, %s43_s30 }
   0xd   :  { %p2655_p3 = scmp.ne.s32.totalorder %s43_s30, %s2654_s22  ;;  %p2660_p5 = scmp.lt.s32.totalorder %s2654_s22, %s2654_s22 }
   0xf   :  { %p2661_p6 = por %p2660_p5, %p2659_p4 }
  0x11   :  { %p2662_p7 = pnand %p2661_p6, %p2655_p3 }
  0x13   :  { %2665 = shalt.err (!%p2662_p7)
}
  0x14   :  { %s2855_s23 = smov 128   ;;  %s2856_s24 = smov 8  }
  0x15   :  { %48 = dma.hbm_to_vmem [thread:$0]  %s3635_s1, 2048, %s43_s30, [#allocation6], %s2855_s23, %s2855_s23, %s2856_s24  }
  0x16   :  { %s2857_s27 = smov [#allocation8]   ;;  %s2858_s29 = smov [#allocation11]  }
  0x17   :  { %s68_s28 = sshll.u32 %s2857_s27, 4  ;;  %s96_s15 = sshll.u32 %s2858_s29, 4  ;;  %s69_s28 = int_to_ptr.vmem [resolvable:$true] %s68_s28  ;;  %s97_s15 = int_to_ptr.vmem [resolvable:$true] %s96_s15 }
  0x18   :  { %s2666_s18 = scalar_lea.hbm %s3638_s4, 1024 }
  0x19   :  { %p2667_p8 = scmp.ne.s32.totalorder %s3638_s4, %s2666_s18  ;;  %p2670_p9 = scmp.lt.u32.totalorder %s2666_s18, %s3638_s4 }
  0x1b   :  { %p2672_p10 = pnand %p2670_p9, %p2667_p8 }
  0x1d   :  { %2675 = shalt.err (!%p2672_p10)
}
  0x1e   :  { %s2676_s1 = scalar_lea.vmem %s69_s28, 1024  ;;  %p2681_p12 = scmp.lt.s32.totalorder %s69_s28, %s69_s28 }
  0x1f   :  { %p2677_p11 = scmp.ne.s32.totalorder %s69_s28, %s2676_s1  ;;  %p2682_p13 = scmp.lt.s32.totalorder %s2676_s1, %s2676_s1 }
  0x21   :  { %p2683_p0 = por %p2682_p13, %p2681_p12 }
  0x23   :  { %p2684_p1 = pnand %p2683_p0, %p2677_p11 }
  0x25   :  { %2687 = shalt.err (!%p2684_p1)
}
  0x26   :  { %s2859_s30 = smov 64   ;;  %s2860_s25 = smov 4  }
  0x27   :  { %74 = dma.hbm_to_vmem [thread:$0]  %s3638_s4, 1024, %s69_s28, [#allocation9], %s2859_s30, %s2859_s30, %s2860_s25  }
  0x28   :  { %s2688_s17 = scalar_lea.hbm %s3642_s8, 1024 }
  0x29   :  { %p2689_p2 = scmp.ne.s32.totalorder %s3642_s8, %s2688_s17  ;;  %p2692_p3 = scmp.lt.u32.totalorder %s2688_s17, %s3642_s8 }
  0x2b   :  { %p2694_p4 = pnand %p2692_p3, %p2689_p2 }
  0x2d   :  { %2697 = shalt.err (!%p2694_p4)
}
  0x2e   :  { %s2698_s22 = scalar_lea.vmem %s97_s15, 1024  ;;  %p2703_p6 = scmp.lt.s32.totalorder %s97_s15, %s97_s15 }
  0x2f   :  { %p2699_p5 = scmp.ne.s32.totalorder %s97_s15, %s2698_s22  ;;  %p2704_p7 = scmp.lt.s32.totalorder %s2698_s22, %s2698_s22 }
  0x31   :  { %p2705_p8 = por %p2704_p7, %p2703_p6 }
  0x33   :  { %p2706_p9 = pnand %p2705_p8, %p2699_p5 }
  0x35   :  { %2709 = shalt.err (!%p2706_p9)
}
  0x36   :  { %102 = dma.hbm_to_vmem [thread:$0]  %s3642_s8, 1024, %s97_s15, [#allocation12], %s2859_s30, %s2859_s30, %s2860_s25  }
  0x37   :  { %s2861_s1 = smov [#allocation2]   ;;  %s2862_s27 = smov [#allocation7]  }
  0x38   :  { %s30_s26 = sshll.u32 %s2861_s1, 4  ;;  %s54_s29 = sshll.u32 %s2862_s27, 4  ;;  %s31_s26 = int_to_ptr.vmem [resolvable:$true] %s30_s26  ;;  %s55_s29 = int_to_ptr.vmem [resolvable:$true] %s54_s29 }
  0x39   :  { %s2710_s18 = scalar_lea.hbm %s3634_s0, 1024 }
  0x3a   :  { %p2711_p10 = scmp.ne.s32.totalorder %s3634_s0, %s2710_s18  ;;  %p2714_p11 = scmp.lt.u32.totalorder %s2710_s18, %s3634_s0 }
  0x3c   :  { %p2716_p12 = pnand %p2714_p11, %p2711_p10 }
  0x3e   :  { %2719 = shalt.err (!%p2716_p12)
}
  0x3f   :  { %s2720_s8 = scalar_lea.vmem %s31_s26, 1024  ;;  %p2725_p0 = scmp.lt.s32.totalorder %s31_s26, %s31_s26 }
  0x40   :  { %p2721_p13 = scmp.ne.s32.totalorder %s31_s26, %s2720_s8  ;;  %p2726_p1 = scmp.lt.s32.totalorder %s2720_s8, %s2720_s8 }
  0x42   :  { %p2727_p2 = por %p2726_p1, %p2725_p0 }
  0x44   :  { %p2728_p3 = pnand %p2727_p2, %p2721_p13 }
  0x46   :  { %2731 = shalt.err (!%p2728_p3)
}
  0x47   :  { %36 = dma.hbm_to_vmem [thread:$0]  %s3634_s0, 1024, %s31_s26, [#allocation3], %s2859_s30, %s2859_s30, %s2860_s25  }
  0x48   :  { %s2732_s27 = scalar_lea.hbm %s3636_s2, 1024 }
  0x49   :  { %p2733_p4 = scmp.ne.s32.totalorder %s3636_s2, %s2732_s27  ;;  %p2736_p5 = scmp.lt.u32.totalorder %s2732_s27, %s3636_s2 }
  0x4b   :  { %p2738_p6 = pnand %p2736_p5, %p2733_p4 }
  0x4d   :  { %2741 = shalt.err (!%p2738_p6)
}
  0x4e   :  { %s2742_s20 = scalar_lea.vmem %s55_s29, 1024  ;;  %p2747_p8 = scmp.lt.s32.totalorder %s55_s29, %s55_s29 }
  0x4f   :  { %p2743_p7 = scmp.ne.s32.totalorder %s55_s29, %s2742_s20  ;;  %p2748_p9 = scmp.lt.s32.totalorder %s2742_s20, %s2742_s20 }
  0x51   :  { %p2749_p10 = por %p2748_p9, %p2747_p8 }
  0x53   :  { %p2750_p11 = pnand %p2749_p10, %p2743_p7 }
  0x55   :  { %2753 = shalt.err (!%p2750_p11)
}
  0x56   :  { %60 = dma.hbm_to_vmem [thread:$0]  %s3636_s2, 1024, %s55_s29, [#allocation6], %s2859_s30, %s2859_s30, %s2860_s25  }
  0x57   :  { %s2863_s21 = smov [#allocation10]   ;;  %s2864_s8 = smov [#allocation13]  }
  0x58   :  { %s82_s22 = sshll.u32 %s2863_s21, 4  ;;  %s110_s15 = sshll.u32 %s2864_s8, 4  ;;  %s83_s22 = int_to_ptr.vmem [resolvable:$true] %s82_s22  ;;  %s111_s15 = int_to_ptr.vmem [resolvable:$true] %s110_s15 }
  0x59   :  { %s2754_s1 = scalar_lea.hbm %s3640_s6, 1024 }
  0x5a   :  { %p2755_p12 = scmp.ne.s32.totalorder %s3640_s6, %s2754_s1  ;;  %p2758_p13 = scmp.lt.u32.totalorder %s2754_s1, %s3640_s6 }
  0x5c   :  { %p2760_p0 = pnand %p2758_p13, %p2755_p12 }
  0x5e   :  { %2763 = shalt.err (!%p2760_p0)
}
  0x5f   :  { %s2764_s2 = scalar_lea.vmem %s83_s22, 1024  ;;  %p2769_p2 = scmp.lt.s32.totalorder %s83_s22, %s83_s22 }
  0x60   :  { %p2765_p1 = scmp.ne.s32.totalorder %s83_s22, %s2764_s2  ;;  %p2770_p3 = scmp.lt.s32.totalorder %s2764_s2, %s2764_s2 }
  0x62   :  { %p2771_p4 = por %p2770_p3, %p2769_p2 }
  0x64   :  { %p2772_p5 = pnand %p2771_p4, %p2765_p1 }
  0x66   :  { %2775 = shalt.err (!%p2772_p5)
}
  0x67   :  { %88 = dma.hbm_to_vmem [thread:$0]  %s3640_s6, 1024, %s83_s22, [#allocation9], %s2859_s30, %s2859_s30, %s2860_s25  }
  0x68   :  { %s2776_s26 = scalar_lea.hbm %s3644_s10, 1024 }
  0x69   :  { %p2777_p6 = scmp.ne.s32.totalorder %s3644_s10, %s2776_s26  ;;  %p2780_p7 = scmp.lt.u32.totalorder %s2776_s26, %s3644_s10 }
  0x6b   :  { %p2782_p8 = pnand %p2780_p7, %p2777_p6 }
  0x6d   :  { %2785 = shalt.err (!%p2782_p8)
}
  0x6e   :  { %s2786_s1 = scalar_lea.vmem %s111_s15, 1024  ;;  %p2791_p10 = scmp.lt.s32.totalorder %s111_s15, %s111_s15 }
  0x6f   :  { %p2787_p9 = scmp.ne.s32.totalorder %s111_s15, %s2786_s1  ;;  %p2792_p11 = scmp.lt.s32.totalorder %s2786_s1, %s2786_s1 }
  0x71   :  { %p2793_p12 = por %p2792_p11, %p2791_p10 }
  0x73   :  { %p2794_p13 = pnand %p2793_p12, %p2787_p9 }
  0x75   :  { %2797 = shalt.err (!%p2794_p13)
}
  0x76   :  { %116 = dma.hbm_to_vmem [thread:$0]  %s3644_s10, 1024, %s111_s15, [#allocation12], %s2859_s30, %s2859_s30, %s2860_s25  }
  0x77   :  { %s2865_s27 = smov [#allocation14]   ;;  %s2798_s2 = scalar_lea.hbm %s3646_s12, 1024 }
  0x78   :  { %s124_s16 = sshll.u32 %s2865_s27, 4  ;;  %p2799_p0 = scmp.ne.s32.totalorder %s3646_s12, %s2798_s2  ;;  %s125_s16 = int_to_ptr.vmem [resolvable:$true] %s124_s16 }
  0x79   :  { %p2802_p1 = scmp.lt.u32.totalorder %s2798_s2, %s3646_s12 }
  0x7b   :  { %p2804_p2 = pnand %p2802_p1, %p2799_p0 }
  0x7d   :  { %2807 = shalt.err (!%p2804_p2)
}
  0x7e   :  { %s2808_s26 = scalar_lea.vmem %s125_s16, 1024  ;;  %p2813_p4 = scmp.lt.s32.totalorder %s125_s16, %s125_s16 }
  0x7f   :  { %p2809_p3 = scmp.ne.s32.totalorder %s125_s16, %s2808_s26  ;;  %p2814_p5 = scmp.lt.s32.totalorder %s2808_s26, %s2808_s26 }
  0x81   :  { %p2815_p6 = por %p2814_p5, %p2813_p4 }
  0x83   :  { %p2816_p7 = pnand %p2815_p6, %p2809_p3 }
  0x85   :  { %2819 = shalt.err (!%p2816_p7)
}
  0x86   :  { %130 = dma.hbm_to_vmem [thread:$0]  %s3646_s12, 1024, %s125_s16, [#allocation15], %s2859_s30, %s2859_s30, %s2860_s25  }
  0x87   :  { %2842 = dma.done.wait [#allocation3], 1024  }
  0x88   :  { %2843 = vsyncadd [#allocation3], 4294966272 }
  0x89   :  { %2844 = dma.done.wait [#allocation6], 3072  }
  0x8a   :  { %2845 = vsyncadd [#allocation6], 4294964224 }
  0x8b   :  { %2846 = dma.done.wait [#allocation9], 2048  }
  0x8c   :  { %2847 = vsyncadd [#allocation9], 4294965248 }
  0x8d   :  { %2848 = dma.done.wait [#allocation12], 2048  }
  0x8e   :  { %2849 = vsyncadd [#allocation12], 4294965248 }
  0x8f   :  { %2850 = dma.done.wait [#allocation15], 1024  }
  0x90   :  { %2851 = vsyncadd [#allocation15], 4294966272  ;;  %v2524_v0 = vld [vmem:[#allocation2] sm:$0xff]   ;;  %v2525_v1 = vld [vmem:[#allocation2 + $0x8] sm:$0xff]  }
  0x91   :  { %280 = vxpose.xlu0.c.b16.start [1/8] %v2524_v0, 128  ;;  %v2526_v2 = vld [vmem:[#allocation2 + $0x10] sm:$0xff]   ;;  %v3062_v3 = vld [vmem:[#allocation5] sm:$0xff]  ;;  %v3064_v4 = vld [vmem:[#allocation5 + $0x8] sm:$0xff] }
  0x92   :  { %v3066_v5 = vld [vmem:[#allocation5 + $0x10] sm:$0xff]  ;;  %v224_v6 = vpack.c.bf16 %v3064_v4, %v3062_v3  ;;  %v3070_v7 = vld [vmem:[#allocation5 + $0x18] sm:$0xff]  ;;  %v3074_v10 = vld [vmem:[#allocation5 + $0x20] sm:$0xff] }
  0x93   :  { %v2527_v8 = vld [vmem:[#allocation2 + $0x18] sm:$0xff]   ;;  %v225_v9 = vpack.c.bf16 %v3070_v7, %v3066_v5  ;;  %v3076_v11 = vld [vmem:[#allocation5 + $0x28] sm:$0xff]  ;;  %v2528_v12 = vld [vmem:[#allocation2 + $0x20] sm:$0xff]  }
  0x94   :  { %2207 = vmatprep.subr.bf16.mxu0 %v224_v6  ;;  %v3078_v13 = vld [vmem:[#allocation5 + $0x30] sm:$0xff]  ;;  %v226_v14 = vpack.c.bf16 %v3076_v11, %v3074_v10  ;;  %v3082_v15 = vld [vmem:[#allocation5 + $0x38] sm:$0xff]  ;;  %v2532_v16 = vld [vmem:[#allocation7] sm:$0xff]  }
  0x95   :  { %281 = vxpose.xlu0.c.b16.cont [2/8] %v2525_v1, 128  ;;  %2208 = vmatpush3.bf16.msra.mxu0 %v224_v6  ;;  %v2533_v17 = vld [vmem:[#allocation7 + $0x8] sm:$0xff]   ;;  %v3084_v19 = vld [vmem:[#allocation5 + $0x40] sm:$0xff]  ;;  %v227_v20 = vpack.c.bf16 %v3082_v15, %v3078_v13  ;;  %v2534_v22 = vld [vmem:[#allocation7 + $0x10] sm:$0xff]  }
  0x96   :  { %2209 = vmatprep.subr.bf16.mxu0 %v225_v9  ;;  %v2529_v18 = vld [vmem:[#allocation2 + $0x28] sm:$0xff]   ;;  %2239 = vmatprep.subr.bf16.mxu1 %v2532_v16  ;;  %v2530_v23 = vld [vmem:[#allocation2 + $0x30] sm:$0xff]   ;;  %v3092_v25 = vld [vmem:[#allocation5 + $0x58] sm:$0xff] }
  0x97   :  { %v3088_v21 = vld [vmem:[#allocation5 + $0x48] sm:$0xff]  ;;  %2240 = vmatpush3.bf16.msra.mxu1 %v2532_v16  ;;  %v3090_v24 = vld [vmem:[#allocation5 + $0x50] sm:$0xff]  ;;  %v2535_v26 = vld [vmem:[#allocation7 + $0x18] sm:$0xff]  }
  0x98   :  { %2241 = vmatprep.subr.bf16.mxu1 %v2533_v17  ;;  %v228_v27 = vpack.c.bf16 %v3088_v21, %v3084_v19  ;;  %v2531_v28 = vld [vmem:[#allocation2 + $0x38] sm:$0xff]   ;;  %v3096_v29 = vld [vmem:[#allocation5 + $0x60] sm:$0xff]  ;;  %v3098_v30 = vld [vmem:[#allocation5 + $0x68] sm:$0xff]  ;;  %v229_v32 = vpack.c.bf16 %v3092_v25, %v3090_v24 }
  0x99   :  { %282 = vxpose.xlu0.c.b16.cont [3/8] %v2526_v2, 128  ;;  %2210 = vmatpush3.bf16.msra.mxu0 %v225_v9  ;;  %v2536_v31 = vld [vmem:[#allocation7 + $0x20] sm:$0xff]   ;;  %v3102_v33 = vld [vmem:[#allocation5 + $0x70] sm:$0xff]  ;;  %v3104_v34 = vld [vmem:[#allocation5 + $0x78] sm:$0xff]  ;;  %v230_v36 = vpack.c.bf16 %v3098_v30, %v3096_v29 }
  0x9a   :  { %2211 = vmatprep.subr.bf16.mxu0 %v226_v14  ;;  %v2537_v35 = vld [vmem:[#allocation7 + $0x28] sm:$0xff]   ;;  %v231_v37 = vpack.c.bf16 %v3104_v34, %v3102_v33  ;;  %v2538_v46 = vld [vmem:[#allocation7 + $0x30] sm:$0xff]   ;;  %v2539_v47 = vld [vmem:[#allocation7 + $0x38] sm:$0xff]  }
  0x9b   :  { %2242 = vmatpush3.bf16.msra.mxu1 %v2533_v17  ;;  %v2540_v48 = vld [vmem:[#allocation8] sm:$0xff]   ;;  %v2541_v49 = vld [vmem:[#allocation8 + $0x8] sm:$0xff]   ;;  %v2542_v50 = vld [vmem:[#allocation8 + $0x10] sm:$0xff]  }
  0x9c   :  { %2243 = vmatprep.subr.bf16.mxu1 %v2534_v22  ;;  %v2543_v51 = vld [vmem:[#allocation8 + $0x18] sm:$0xff]   ;;  %v2544_v52 = vld [vmem:[#allocation8 + $0x20] sm:$0xff]   ;;  %v2545_v53 = vld [vmem:[#allocation8 + $0x28] sm:$0xff]  }
  0x9d   :  { %283 = vxpose.xlu0.c.b16.cont [4/8] %v2527_v8, 128  ;;  %2212 = vmatpush3.bf16.msra.mxu0 %v226_v14 }
  0x9e   :  { %2213 = vmatprep.subr.bf16.mxu0 %v227_v20 }
  0x9f   :  { %2244 = vmatpush3.bf16.msra.mxu1 %v2534_v22 }
  0xa0   :  { %2245 = vmatprep.subr.bf16.mxu1 %v2535_v26 }
  0xa1   :  { %284 = vxpose.xlu0.c.b16.cont [5/8] %v2528_v12, 128  ;;  %2214 = vmatpush3.bf16.msra.mxu0 %v227_v20 }
  0xa2   :  { %2215 = vmatprep.subr.bf16.mxu0 %v228_v27 }
  0xa3   :  { %2246 = vmatpush3.bf16.msra.mxu1 %v2535_v26 }
  0xa4   :  { %2247 = vmatprep.subr.bf16.mxu1 %v2536_v31 }
  0xa5   :  { %285 = vxpose.xlu0.c.b16.cont [6/8] %v2529_v18, 128  ;;  %2216 = vmatpush3.bf16.msra.mxu0 %v228_v27 }
  0xa6   :  { %2217 = vmatprep.subr.bf16.mxu0 %v229_v32 }
  0xa7   :  { %2248 = vmatpush3.bf16.msra.mxu1 %v2536_v31 }
  0xa8   :  { %2249 = vmatprep.subr.bf16.mxu1 %v2537_v35 }
  0xa9   :  { %286 = vxpose.xlu0.c.b16.cont [7/8] %v2530_v23, 128  ;;  %2218 = vmatpush3.bf16.msra.mxu0 %v229_v32 }
  0xaa   :  { %2219 = vmatprep.subr.bf16.mxu0 %v230_v36 }
  0xab   :  { %2250 = vmatpush3.bf16.msra.mxu1 %v2537_v35  ;;  %v2547_v35 = vld [vmem:[#allocation8 + $0x38] sm:$0xff]  }
  0xac   :  { %2251 = vmatprep.subr.bf16.mxu1 %v2538_v46 }
  0xad   :  { %287 = vxpose.xlu0.c.b16.end [8/8] %v2531_v28, 128  ;;  %2220 = vmatpush3.bf16.msra.mxu0 %v230_v36 }
  0xae   :  { %2221 = vmatprep.subr.bf16.mxu0 %v231_v37 }
  0xaf   :  { %2252 = vmatpush3.bf16.msra.mxu1 %v2538_v46 }
  0xb0   :  { %2253 = vmatprep.subr.bf16.mxu1 %v2539_v47 }
  0xb1   :  { %2222 = vmatpush3.bf16.msra.mxu0 %v231_v37 }
  0xb2   :  { %2271 = vmatprep.subr.bf16.mxu0 %v2540_v48 }
  0xb3   :  { %2254 = vmatpush3.bf16.msra.mxu1 %v2539_v47 }
  0xf7   :  { %v3110_v38 = vpop.trf.xlu0 }
  0xf8   :  { %2223 = vmatprep.mubr.bf16.mxu0 %v3110_v38 }
  0xfb   :  { %v3113_v39 = vpop.trf.xlu0 }
  0xfc   :  { %2224 = vmatmul.mubr.bf16.vlgmr.msra.gmra.mrb[0].mxu0 %v3113_v39 }
  0xfd   :  { %2272 = vmatpush3.bf16.msra.mxu0 %v2540_v48 }
  0xfe   :  { %2273 = vmatprep.subr.bf16.mxu0 %v2541_v49 }
  0xff   :  { %v3116_v40 = vpop.trf.xlu0 }
 0x100   :  { %2227 = vmatprep.mubr.bf16.mxu0 %v3116_v40 }
 0x101   :  { %2274 = vmatpush3.bf16.msra.mxu0 %v2541_v49 }
 0x102   :  { %2275 = vmatprep.subr.bf16.mxu0 %v2542_v50 }
 0x103   :  { %v3119_v41 = vpop.trf.xlu0 }
 0x104   :  { %2228 = vmatmul.mubr.bf16.gmra.mrb[4].mxu0 %v3119_v41 }
 0x105   :  { %2276 = vmatpush3.bf16.msra.mxu0 %v2542_v50 }
 0x106   :  { %2277 = vmatprep.subr.bf16.mxu0 %v2543_v51 }
 0x107   :  { %v3122_v42 = vpop.trf.xlu0 }
 0x108   :  { %2231 = vmatprep.mubr.bf16.mxu0 %v3122_v42 }
 0x109   :  { %2278 = vmatpush3.bf16.msra.mxu0 %v2543_v51 }
 0x10a   :  { %2279 = vmatprep.subr.bf16.mxu0 %v2544_v52 }
 0x10b   :  { %v3125_v43 = vpop.trf.xlu0 }
 0x10c   :  { %2232 = vmatmul.mubr.bf16.gmra.mrb[8].mxu0 %v3125_v43 }
 0x10d   :  { %2280 = vmatpush3.bf16.msra.mxu0 %v2544_v52 }
 0x10e   :  { %2281 = vmatprep.subr.bf16.mxu0 %v2545_v53 }
 0x10f   :  { %v3128_v44 = vpop.trf.xlu0 }
 0x110   :  { %2235 = vmatprep.mubr.bf16.mxu0 %v3128_v44 }
 0x111   :  { %2282 = vmatpush3.bf16.msra.mxu0 %v2545_v53 }
 0x113   :  { %v3131_v45 = vpop.trf.xlu0 }
 0x114   :  { %2236 = vmatmul.mubr.bf16.gmra.mrb[12].mxu0 %v3131_v45 }
 0x1cf   :  { %v2225_v54 = vpop.f32.mrb[0].mxu0 }
 0x1d0   :  { %v330_v55 = vpop.f32.mrb[1].mxu0  ;;  %v395_v57 = vadd.f32 %v2225_v54, %v3066_v5 }
 0x1d1   :  { %v2226_v56 = vpop.f32.mrb[2].mxu0  ;;  %v393_v60 = vadd.f32 %v330_v55, %v3062_v3 }
 0x1d2   :  { %v396_v58 = vadd.f32 %v2226_v56, %v3070_v7  ;;  %v333_v59 = vpop.f32.mrb[3].mxu0 }
 0x1d3   :  { %v394_v61 = vadd.f32 %v333_v59, %v3064_v4 }
 0x1d4   :  { %v410_v62 = vpack.c.bf16 %v396_v58, %v395_v57 }
 0x1d5   :  { %v409_v63 = vpack.c.bf16 %v394_v61, %v393_v60 }
 0x1d7   :  { %v2229_v0 = vpop.f32.mrb[4].mxu0  ;;  %2255 = vmatprep.mubr.bf16.mxu1 %v409_v63 }
 0x1d8   :  { %v346_v1 = vpop.f32.mrb[5].mxu0  ;;  %2256 = vmatmul.mubr.bf16.vlgmr.msra.gmra.mrb[0].mxu1 %v410_v62  ;;  %v399_v6 = vadd.f32 %v2229_v0, %v3078_v13 }
 0x1d9   :  { %v2230_v2 = vpop.f32.mrb[6].mxu0  ;;  %v397_v5 = vadd.f32 %v346_v1, %v3074_v10 }
 0x1da   :  { %v400_v8 = vadd.f32 %v2230_v2, %v3082_v15  ;;  %v349_v9 = vpop.f32.mrb[7].mxu0 }
 0x1db   :  { %v398_v7 = vadd.f32 %v349_v9, %v3076_v11 }
 0x1dc   :  { %v412_v12 = vpack.c.bf16 %v400_v8, %v399_v6 }
 0x1dd   :  { %v411_v3 = vpack.c.bf16 %v398_v7, %v397_v5 }
 0x1df   :  { %v2233_v14 = vpop.f32.mrb[8].mxu0  ;;  %2259 = vmatprep.mubr.bf16.mxu1 %v411_v3 }
 0x1e0   :  { %v362_v4 = vpop.f32.mrb[9].mxu0  ;;  %2260 = vmatmul.mubr.bf16.gmra.mrb[4].mxu1 %v412_v12  ;;  %v403_v17 = vadd.f32 %v2233_v14, %v3090_v24 }
 0x1e1   :  { %v2234_v16 = vpop.f32.mrb[10].mxu0  ;;  %v401_v13 = vadd.f32 %v362_v4, %v3084_v19 }
 0x1e2   :  { %v404_v18 = vadd.f32 %v2234_v16, %v3092_v25  ;;  %v365_v20 = vpop.f32.mrb[11].mxu0 }
 0x1e3   :  { %v402_v15 = vadd.f32 %v365_v20, %v3088_v21  ;;  %v2546_v21 = vld [vmem:[#allocation8 + $0x30] sm:$0xff]  }
 0x1e4   :  { %v414_v22 = vpack.c.bf16 %v404_v18, %v403_v17  ;;  %2283 = vmatprep.subr.bf16.mxu0 %v2546_v21 }
 0x1e5   :  { %v413_v10 = vpack.c.bf16 %v402_v15, %v401_v13  ;;  %2284 = vmatpush3.bf16.msra.mxu0 %v2546_v21 }
 0x1e6   :  { %2285 = vmatprep.subr.bf16.mxu0 %v2547_v35 }
 0x1e7   :  { %v2237_v23 = vpop.f32.mrb[12].mxu0  ;;  %2263 = vmatprep.mubr.bf16.mxu1 %v413_v10 }
 0x1e8   :  { %v378_v11 = vpop.f32.mrb[13].mxu0  ;;  %2264 = vmatmul.mubr.bf16.gmra.mrb[8].mxu1 %v414_v22  ;;  %v407_v27 = vadd.f32 %v2237_v23, %v3102_v33  ;;  %v2009_v33 = vld [vmem:[%s3637_s3] ss:$0 sm:$0xff] }
 0x1e9   :  { %v2238_v26 = vpop.f32.mrb[14].mxu0  ;;  %v405_v24 = vadd.f32 %v378_v11, %v3096_v29  ;;  %2286 = vmatpush3.bf16.msra.mxu0 %v2547_v35 }
 0x1ea   :  { %v408_v28 = vadd.f32 %v2238_v26, %v3104_v34  ;;  %v381_v31 = vpop.f32.mrb[15].mxu0 }
 0x1eb   :  { %v406_v25 = vadd.f32 %v381_v31, %v3098_v30 }
 0x1ec   :  { %v416_v32 = vpack.c.bf16 %v408_v28, %v407_v27 }
 0x1ed   :  { %v415_v19 = vpack.c.bf16 %v406_v25, %v405_v24 }
 0x1ef   :  { %2267 = vmatprep.mubr.bf16.mxu1 %v415_v19 }
 0x1f0   :  { %2268 = vmatmul.mubr.bf16.gmra.mrb[12].mxu1 %v416_v32 }
 0x1f1   :  { %2319 = vmatprep.mubr.bf16.mxu1 %v3110_v38 }
 0x2ab   :  { %v2257_v34 = vpop.f32.mrb[0].mxu1 }
 0x2ac   :  { %v514_v29 = vadd.f32 %v2257_v34, %v2009_v33  ;;  %v505_v36 = vpop.f32.mrb[1].mxu1 }
 0x2ad   :  { %v506_v30 = vadd.f32 %v2009_v33, %v505_v36  ;;  %v2258_v37 = vpop.f32.mrb[2].mxu1  ;;  %v2549_v36 = vld [vmem:[#allocation10 + $0x8] sm:$0xff]  }
 0x2ae   :  { %v517_v46 = vadd.f32 %v2258_v37, %v2009_v33  ;;  %v508_v47 = vpop.f32.mrb[3].mxu1  ;;  %v570_v49 = vmax.f32 %v514_v29, 0.0  ;;  %v2548_v29 = vld [vmem:[#allocation10] sm:$0xff]   ;;  %v2551_v37 = vld [vmem:[#allocation10 + $0x18] sm:$0xff]  }
 0x2af   :  { %v509_v48 = vadd.f32 %v2009_v33, %v508_v47  ;;  %v568_v51 = vmax.f32 %v506_v30, 0.0  ;;  %2335 = vmatprep.subr.bf16.mxu0 %v2548_v29  ;;  %v2550_v30 = vld [vmem:[#allocation10 + $0x10] sm:$0xff]   ;;  %v2018_v47 = vld [vmem:[%s3639_s5] ss:$0 sm:$0xff] }
 0x2b0   :  { %v571_v50 = vmax.f32 %v517_v46, 0.0  ;;  %v2553_v46 = vld [vmem:[#allocation10 + $0x28] sm:$0xff]  }
 0x2b1   :  { %v569_v52 = vmax.f32 %v509_v48, 0.0 }
 0x2b2   :  { %v585_v53 = vpack.c.bf16 %v571_v50, %v570_v49 }
 0x2b3   :  { %v584_v54 = vpack.c.bf16 %v569_v52, %v568_v51  ;;  %v2261_v55 = vpop.f32.mrb[4].mxu1 }
 0x2b4   :  { %v530_v56 = vadd.f32 %v2261_v55, %v2009_v33  ;;  %v521_v57 = vpop.f32.mrb[5].mxu1 }
 0x2b5   :  { %v522_v58 = vadd.f32 %v2009_v33, %v521_v57  ;;  %v2262_v59 = vpop.f32.mrb[6].mxu1  ;;  %2287 = vmatprep.mubr.bf16.mxu0 %v584_v54 }
 0x2b6   :  { %v533_v60 = vadd.f32 %v2262_v59, %v2009_v33  ;;  %v524_v61 = vpop.f32.mrb[7].mxu1  ;;  %2288 = vmatmul.mubr.bf16.vlgmr.msra.gmra.mrb[16].mxu0 %v585_v53  ;;  %v574_v63 = vmax.f32 %v530_v56, 0.0 }
 0x2b7   :  { %v525_v62 = vadd.f32 %v2009_v33, %v524_v61  ;;  %v572_v1 = vmax.f32 %v522_v58, 0.0  ;;  %2336 = vmatpush3.bf16.msra.mxu0 %v2548_v29 }
 0x2b8   :  { %v575_v0 = vmax.f32 %v533_v60, 0.0  ;;  %2337 = vmatprep.subr.bf16.mxu0 %v2549_v36 }
 0x2b9   :  { %v573_v2 = vmax.f32 %v525_v62, 0.0 }
 0x2ba   :  { %v587_v6 = vpack.c.bf16 %v575_v0, %v574_v63 }
 0x2bb   :  { %v586_v8 = vpack.c.bf16 %v573_v2, %v572_v1  ;;  %v2265_v9 = vpop.f32.mrb[8].mxu1  ;;  %2338 = vmatpush3.bf16.msra.mxu0 %v2549_v36 }
 0x2bc   :  { %v546_v5 = vadd.f32 %v2265_v9, %v2009_v33  ;;  %v537_v7 = vpop.f32.mrb[9].mxu1  ;;  %2339 = vmatprep.subr.bf16.mxu0 %v2550_v30 }
 0x2bd   :  { %v538_v12 = vadd.f32 %v2009_v33, %v537_v7  ;;  %v2266_v3 = vpop.f32.mrb[10].mxu1  ;;  %2291 = vmatprep.mubr.bf16.mxu0 %v586_v8 }
 0x2be   :  { %v549_v14 = vadd.f32 %v2266_v3, %v2009_v33  ;;  %v540_v4 = vpop.f32.mrb[11].mxu1  ;;  %2292 = vmatmul.mubr.bf16.gmra.mrb[20].mxu0 %v587_v6  ;;  %v578_v17 = vmax.f32 %v546_v5, 0.0 }
 0x2bf   :  { %v541_v16 = vadd.f32 %v2009_v33, %v540_v4  ;;  %v576_v20 = vmax.f32 %v538_v12, 0.0  ;;  %2340 = vmatpush3.bf16.msra.mxu0 %v2550_v30 }
 0x2c0   :  { %v579_v18 = vmax.f32 %v549_v14, 0.0  ;;  %2341 = vmatprep.subr.bf16.mxu0 %v2551_v37 }
 0x2c1   :  { %v577_v13 = vmax.f32 %v541_v16, 0.0 }
 0x2c2   :  { %v589_v15 = vpack.c.bf16 %v579_v18, %v578_v17 }
 0x2c3   :  { %v588_v22 = vpack.c.bf16 %v577_v13, %v576_v20  ;;  %v2269_v10 = vpop.f32.mrb[12].mxu1  ;;  %2342 = vmatpush3.bf16.msra.mxu0 %v2551_v37 }
 0x2c4   :  { %v562_v23 = vadd.f32 %v2269_v10, %v2009_v33  ;;  %v553_v11 = vpop.f32.mrb[13].mxu1 }
 0x2c5   :  { %v554_v26 = vadd.f32 %v2009_v33, %v553_v11  ;;  %v2270_v27 = vpop.f32.mrb[14].mxu1  ;;  %2295 = vmatprep.mubr.bf16.mxu0 %v588_v22 }
 0x2c6   :  { %v565_v28 = vadd.f32 %v2270_v27, %v2009_v33  ;;  %v556_v31 = vpop.f32.mrb[15].mxu1  ;;  %2296 = vmatmul.mubr.bf16.gmra.mrb[24].mxu0 %v589_v15  ;;  %v582_v25 = vmax.f32 %v562_v23, 0.0 }
 0x2c7   :  { %v557_v24 = vadd.f32 %v2009_v33, %v556_v31  ;;  %v580_v19 = vmax.f32 %v554_v26, 0.0  ;;  %v2552_v33 = vld [vmem:[#allocation10 + $0x20] sm:$0xff]  }
 0x2c8   :  { %v583_v32 = vmax.f32 %v565_v28, 0.0  ;;  %2343 = vmatprep.subr.bf16.mxu0 %v2552_v33 }
 0x2c9   :  { %v581_v21 = vmax.f32 %v557_v24, 0.0  ;;  %2344 = vmatpush3.bf16.msra.mxu0 %v2552_v33 }
 0x2ca   :  { %v591_v35 = vpack.c.bf16 %v583_v32, %v582_v25  ;;  %2345 = vmatprep.subr.bf16.mxu0 %v2553_v46 }
 0x2cb   :  { %v590_v34 = vpack.c.bf16 %v581_v21, %v580_v19 }
 0x2cd   :  { %2299 = vmatprep.mubr.bf16.mxu0 %v590_v34  ;;  %2346 = vmatpush3.bf16.msra.mxu0 %v2553_v46 }
 0x2ce   :  { %2300 = vmatmul.mubr.bf16.gmra.mrb[28].mxu0 %v591_v35 }
 0x389   :  { %v2289_v48 = vpop.f32.mrb[16].mxu0 }
 0x38a   :  { %v680_v49 = vpop.f32.mrb[17].mxu0  ;;  %v3161_v54 = vadd.f32 %v2289_v48, %v2018_v47  ;;  %v2554_v48 = vld [vmem:[#allocation10 + $0x30] sm:$0xff]  }
 0x38b   :  { %v3157_v50 = vadd.f32 %v2018_v47, %v680_v49  ;;  %v2290_v51 = vpop.f32.mrb[18].mxu0  ;;  %2347 = vmatprep.subr.bf16.mxu0 %v2554_v48  ;;  %v2555_v49 = vld [vmem:[#allocation10 + $0x38] sm:$0xff]  }
 0x38c   :  { %v3159_v52 = vadd.f32 %v2290_v51, %v2018_v47  ;;  %v683_v53 = vpop.f32.mrb[19].mxu0  ;;  %v745_v59 = vmax.f32 %v3161_v54, 0.0  ;;  %2348 = vmatpush3.bf16.msra.mxu0 %v2554_v48  ;;  %v2556_v51 = vld [vmem:[#allocation11] sm:$0xff]  }
 0x38d   :  { %v3163_v55 = vadd.f32 %v2018_v47, %v683_v53  ;;  %v743_v56 = vmax.f32 %v3157_v50, 0.0  ;;  %2349 = vmatprep.subr.bf16.mxu0 %v2555_v49  ;;  %v2557_v53 = vld [vmem:[#allocation11 + $0x8] sm:$0xff]  }
 0x38e   :  { %v746_v57 = vmax.f32 %v3159_v52, 0.0 }
 0x38f   :  { %v744_v58 = vmax.f32 %v3163_v55, 0.0 }
 0x390   :  { %v794_v63 = vpack.c.bf16 %v746_v57, %v745_v59  ;;  %2350 = vmatpush3.bf16.msra.mxu0 %v2555_v49 }
 0x391   :  { %v793_v60 = vpack.c.bf16 %v744_v58, %v743_v56  ;;  %v2293_v61 = vpop.f32.mrb[20].mxu0 }
 0x392   :  { %v696_v62 = vpop.f32.mrb[21].mxu0  ;;  %v3181_v8 = vadd.f32 %v2293_v61, %v2018_v47  ;;  %v2559_v61 = vld [vmem:[#allocation11 + $0x18] sm:$0xff]  }
 0x393   :  { %v3177_v0 = vadd.f32 %v2018_v47, %v696_v62  ;;  %v2294_v1 = vpop.f32.mrb[22].mxu0  ;;  %2303 = vmatprep.subr.bf16.mxu1 %v793_v60  ;;  %v2560_v62 = vld [vmem:[#allocation11 + $0x20] sm:$0xff]  }
 0x394   :  { %v3179_v2 = vadd.f32 %v2294_v1, %v2018_v47  ;;  %v699_v6 = vpop.f32.mrb[23].mxu0  ;;  %2304 = vmatpush3.bf16.msra.mxu1 %v793_v60  ;;  %v749_v3 = vmax.f32 %v3181_v8, 0.0  ;;  %v2558_v60 = vld [vmem:[#allocation11 + $0x10] sm:$0xff]  }
 0x395   :  { %v3183_v9 = vadd.f32 %v2018_v47, %v699_v6  ;;  %2305 = vmatprep.subr.bf16.mxu1 %v794_v63  ;;  %v747_v5 = vmax.f32 %v3177_v0, 0.0 }
 0x396   :  { %v750_v7 = vmax.f32 %v3179_v2, 0.0 }
 0x397   :  { %v748_v12 = vmax.f32 %v3183_v9, 0.0 }
 0x398   :  { %2306 = vmatpush3.bf16.msra.mxu1 %v794_v63  ;;  %v796_v17 = vpack.c.bf16 %v750_v7, %v749_v3  ;;  %v2561_v63 = vld [vmem:[#allocation11 + $0x28] sm:$0xff]  }
 0x399   :  { %v795_v14 = vpack.c.bf16 %v748_v12, %v747_v5  ;;  %v2297_v4 = vpop.f32.mrb[24].mxu0 }
 0x39a   :  { %v712_v16 = vpop.f32.mrb[25].mxu0  ;;  %v3201_v22 = vadd.f32 %v2297_v4, %v2018_v47 }
 0x39b   :  { %v3197_v18 = vadd.f32 %v2018_v47, %v712_v16  ;;  %v2298_v20 = vpop.f32.mrb[26].mxu0  ;;  %2307 = vmatprep.subr.bf16.mxu1 %v795_v14 }
 0x39c   :  { %v3199_v13 = vadd.f32 %v2298_v20, %v2018_v47  ;;  %v715_v15 = vpop.f32.mrb[27].mxu0  ;;  %2308 = vmatpush3.bf16.msra.mxu1 %v795_v14  ;;  %v753_v27 = vmax.f32 %v3201_v22, 0.0 }
 0x39d   :  { %v3203_v10 = vadd.f32 %v2018_v47, %v715_v15  ;;  %2309 = vmatprep.subr.bf16.mxu1 %v796_v17  ;;  %v751_v23 = vmax.f32 %v3197_v18, 0.0 }
 0x39e   :  { %v754_v11 = vmax.f32 %v3199_v13, 0.0 }
 0x39f   :  { %v752_v26 = vmax.f32 %v3203_v10, 0.0 }
 0x3a0   :  { %2310 = vmatpush3.bf16.msra.mxu1 %v796_v17  ;;  %v798_v25 = vpack.c.bf16 %v754_v11, %v753_v27 }
 0x3a1   :  { %v797_v28 = vpack.c.bf16 %v752_v26, %v751_v23  ;;  %v2301_v31 = vpop.f32.mrb[28].mxu0 }
 0x3a2   :  { %v728_v24 = vpop.f32.mrb[29].mxu0  ;;  %v3221_v34 = vadd.f32 %v2301_v31, %v2018_v47 }
 0x3a3   :  { %v3217_v32 = vadd.f32 %v2018_v47, %v728_v24  ;;  %v2302_v19 = vpop.f32.mrb[30].mxu0  ;;  %2311 = vmatprep.subr.bf16.mxu1 %v797_v28 }
 0x3a4   :  { %v3219_v21 = vadd.f32 %v2302_v19, %v2018_v47  ;;  %v731_v35 = vpop.f32.mrb[31].mxu0  ;;  %2312 = vmatpush3.bf16.msra.mxu1 %v797_v28  ;;  %v757_v33 = vmax.f32 %v3221_v34, 0.0  ;;  %v2563_v34 = vld [vmem:[#allocation11 + $0x38] sm:$0xff]  }
 0x3a5   :  { %v3223_v29 = vadd.f32 %v2018_v47, %v731_v35  ;;  %2313 = vmatprep.subr.bf16.mxu1 %v798_v25  ;;  %v755_v36 = vmax.f32 %v3217_v32, 0.0  ;;  %v2027_v32 = vld [vmem:[%s3641_s7] ss:$0 sm:$0xff] }
 0x3a6   :  { %v758_v30 = vmax.f32 %v3219_v21, 0.0 }
 0x3a7   :  { %v756_v37 = vmax.f32 %v3223_v29, 0.0 }
 0x3a8   :  { %2314 = vmatpush3.bf16.msra.mxu1 %v798_v25  ;;  %v800_v47 = vpack.c.bf16 %v758_v30, %v757_v33 }
 0x3a9   :  { %v799_v46 = vpack.c.bf16 %v756_v37, %v755_v36 }
 0x3ab   :  { %2315 = vmatprep.subr.bf16.mxu1 %v799_v46 }
 0x3ac   :  { %2316 = vmatpush3.bf16.msra.mxu1 %v799_v46 }
 0x3ad   :  { %2317 = vmatprep.subr.bf16.mxu1 %v800_v47 }
 0x3b0   :  { %2318 = vmatpush3.bf16.msra.mxu1 %v800_v47 }
 0x3b1   :  { %2367 = vmatprep.subr.bf16.mxu1 %v2556_v51 }
 0x3b3   :  { %2320 = vmatmul.mubr.bf16.vlgmr.msra.gmra.mrb[16].mxu1 %v3113_v39 }
 0x3b4   :  { %2323 = vmatprep.mubr.bf16.mxu1 %v3116_v40  ;;  %2368 = vmatpush3.bf16.msra.mxu1 %v2556_v51 }
 0x3b5   :  { %2369 = vmatprep.subr.bf16.mxu1 %v2557_v53 }
 0x3b8   :  { %2370 = vmatpush3.bf16.msra.mxu1 %v2557_v53 }
 0x3b9   :  { %2371 = vmatprep.subr.bf16.mxu1 %v2558_v60 }
 0x3bb   :  { %2324 = vmatmul.mubr.bf16.gmra.mrb[20].mxu1 %v3119_v41 }
 0x3bc   :  { %2327 = vmatprep.mubr.bf16.mxu1 %v3122_v42  ;;  %2372 = vmatpush3.bf16.msra.mxu1 %v2558_v60 }
 0x3bd   :  { %2373 = vmatprep.subr.bf16.mxu1 %v2559_v61 }
 0x3c0   :  { %2374 = vmatpush3.bf16.msra.mxu1 %v2559_v61 }
 0x3c1   :  { %2375 = vmatprep.subr.bf16.mxu1 %v2560_v62 }
 0x3c3   :  { %2328 = vmatmul.mubr.bf16.gmra.mrb[24].mxu1 %v3125_v43 }
 0x3c4   :  { %2331 = vmatprep.mubr.bf16.mxu1 %v3128_v44  ;;  %2376 = vmatpush3.bf16.msra.mxu1 %v2560_v62 }
 0x3c5   :  { %2377 = vmatprep.subr.bf16.mxu1 %v2561_v63 }
 0x3c8   :  { %2378 = vmatpush3.bf16.msra.mxu1 %v2561_v63 }
 0x3cb   :  { %2332 = vmatmul.mubr.bf16.gmra.mrb[28].mxu1 %v3131_v45 }
 0x486   :  { %v2321_v1 = vpop.f32.mrb[16].mxu1 }
 0x487   :  { %v835_v6 = vpop.f32.mrb[17].mxu1  ;;  %v900_v4 = vadd.f32 %v2321_v1, %v745_v59 }
 0x488   :  { %v2322_v14 = vpop.f32.mrb[18].mxu1  ;;  %v898_v20 = vadd.f32 %v835_v6, %v743_v56 }
 0x489   :  { %v901_v16 = vadd.f32 %v2322_v14, %v746_v57  ;;  %v838_v17 = vpop.f32.mrb[19].mxu1 }
 0x48a   :  { %v899_v15 = vadd.f32 %v838_v17, %v744_v58 }
 0x48b   :  { %v915_v28 = vpack.c.bf16 %v901_v16, %v900_v4 }
 0x48c   :  { %v914_v31 = vpack.c.bf16 %v899_v15, %v898_v20 }
 0x48e   :  { %v2325_v24 = vpop.f32.mrb[20].mxu1  ;;  %2351 = vmatprep.mubr.bf16.mxu0 %v914_v31 }
 0x48f   :  { %v851_v25 = vpop.f32.mrb[21].mxu1  ;;  %2352 = vmatmul.mubr.bf16.vlgmr.msra.gmra.mrb[32].mxu0 %v915_v28  ;;  %v904_v54 = vadd.f32 %v2325_v24, %v749_v3 }
 0x490   :  { %v2326_v19 = vpop.f32.mrb[22].mxu1  ;;  %v902_v50 = vadd.f32 %v851_v25, %v747_v5 }
 0x491   :  { %v905_v52 = vadd.f32 %v2326_v19, %v750_v7  ;;  %v854_v57 = vpop.f32.mrb[23].mxu1 }
 0x492   :  { %v903_v55 = vadd.f32 %v854_v57, %v748_v12 }
 0x493   :  { %v917_v56 = vpack.c.bf16 %v905_v52, %v904_v54 }
 0x494   :  { %v916_v58 = vpack.c.bf16 %v903_v55, %v902_v50 }
 0x496   :  { %v2329_v59 = vpop.f32.mrb[24].mxu1  ;;  %2355 = vmatprep.mubr.bf16.mxu0 %v916_v58 }
 0x497   :  { %v867_v35 = vpop.f32.mrb[25].mxu1  ;;  %2356 = vmatmul.mubr.bf16.gmra.mrb[36].mxu0 %v917_v56  ;;  %v908_v8 = vadd.f32 %v2329_v59, %v753_v27  ;;  %v2562_v27 = vld [vmem:[#allocation11 + $0x30] sm:$0xff]  }
 0x498   :  { %v2330_v46 = vpop.f32.mrb[26].mxu1  ;;  %v906_v0 = vadd.f32 %v867_v35, %v751_v23  ;;  %2379 = vmatprep.subr.bf16.mxu1 %v2562_v27 }
 0x499   :  { %v909_v2 = vadd.f32 %v2330_v46, %v754_v11  ;;  %v870_v7 = vpop.f32.mrb[27].mxu1  ;;  %2380 = vmatpush3.bf16.msra.mxu1 %v2562_v27 }
 0x49a   :  { %v907_v9 = vadd.f32 %v870_v7, %v752_v26  ;;  %2381 = vmatprep.subr.bf16.mxu1 %v2563_v34 }
 0x49b   :  { %v919_v5 = vpack.c.bf16 %v909_v2, %v908_v8 }
 0x49c   :  { %v918_v12 = vpack.c.bf16 %v907_v9, %v906_v0 }
 0x49d   :  { %2382 = vmatpush3.bf16.msra.mxu1 %v2563_v34 }
 0x49e   :  { %v2333_v3 = vpop.f32.mrb[28].mxu1  ;;  %2359 = vmatprep.mubr.bf16.mxu0 %v918_v12 }
 0x49f   :  { %v883_v47 = vpop.f32.mrb[29].mxu1  ;;  %2360 = vmatmul.mubr.bf16.gmra.mrb[40].mxu0 %v919_v5  ;;  %v912_v22 = vadd.f32 %v2333_v3, %v757_v33 }
 0x4a0   :  { %v2334_v48 = vpop.f32.mrb[30].mxu1  ;;  %v910_v18 = vadd.f32 %v883_v47, %v755_v36 }
 0x4a1   :  { %v913_v13 = vadd.f32 %v2334_v48, %v758_v30  ;;  %v886_v11 = vpop.f32.mrb[31].mxu1 }
 0x4a2   :  { %v911_v10 = vadd.f32 %v886_v11, %v756_v37 }
 0x4a3   :  { %v921_v23 = vpack.c.bf16 %v913_v13, %v912_v22 }
 0x4a4   :  { %v920_v26 = vpack.c.bf16 %v911_v10, %v910_v18 }
 0x4a6   :  { %2363 = vmatprep.mubr.bf16.mxu0 %v920_v26 }
 0x4a7   :  { %2364 = vmatmul.mubr.bf16.gmra.mrb[44].mxu0 %v921_v23 }
 0x4a8   :  { %2415 = vmatprep.mubr.bf16.mxu0 %v3110_v38 }
 0x562   :  { %v2353_v21 = vpop.f32.mrb[32].mxu0 }
 0x563   :  { %v1019_v36 = vadd.f32 %v2353_v21, %v2027_v32  ;;  %v1010_v29 = vpop.f32.mrb[33].mxu0  ;;  %v2564_v21 = vld [vmem:[#allocation13] sm:$0xff]  }
 0x564   :  { %v1011_v30 = vadd.f32 %v2027_v32, %v1010_v29  ;;  %v2354_v37 = vpop.f32.mrb[34].mxu0  ;;  %2431 = vmatprep.subr.bf16.mxu1 %v2564_v21  ;;  %v2566_v29 = vld [vmem:[#allocation13 + $0x10] sm:$0xff]  }
 0x565   :  { %v1022_v33 = vadd.f32 %v2354_v37, %v2027_v32  ;;  %v1013_v49 = vpop.f32.mrb[35].mxu0  ;;  %v1075_v53 = vmax.f32 %v1019_v36, 0.0  ;;  %v2565_v36 = vld [vmem:[#allocation13 + $0x8] sm:$0xff]  }
 0x566   :  { %v1014_v51 = vadd.f32 %v2027_v32, %v1013_v49  ;;  %v1073_v60 = vmax.f32 %v1011_v30, 0.0  ;;  %v2567_v30 = vld [vmem:[#allocation13 + $0x18] sm:$0xff]   ;;  %v2569_v37 = vld [vmem:[#allocation13 + $0x28] sm:$0xff]  }
 0x567   :  { %v1076_v38 = vmax.f32 %v1022_v33, 0.0  ;;  %v2036_v33 = vld [vmem:[%s3643_s9] ss:$0 sm:$0xff] }
 0x568   :  { %v1074_v61 = vmax.f32 %v1014_v51, 0.0 }
 0x569   :  { %v1090_v62 = vpack.c.bf16 %v1076_v38, %v1075_v53 }
 0x56a   :  { %v1089_v63 = vpack.c.bf16 %v1074_v61, %v1073_v60  ;;  %v2357_v1 = vpop.f32.mrb[36].mxu0 }
 0x56b   :  { %v1035_v6 = vadd.f32 %v2357_v1, %v2027_v32  ;;  %v1026_v14 = vpop.f32.mrb[37].mxu0 }
 0x56c   :  { %v1027_v4 = vadd.f32 %v2027_v32, %v1026_v14  ;;  %v2358_v16 = vpop.f32.mrb[38].mxu0  ;;  %2383 = vmatprep.mubr.bf16.mxu1 %v1089_v63 }
 0x56d   :  { %v1038_v17 = vadd.f32 %v2358_v16, %v2027_v32  ;;  %v1029_v20 = vpop.f32.mrb[39].mxu0  ;;  %2384 = vmatmul.mubr.bf16.vlgmr.msra.gmra.mrb[32].mxu1 %v1090_v62  ;;  %v1079_v28 = vmax.f32 %v1035_v6, 0.0 }
 0x56e   :  { %v1030_v15 = vadd.f32 %v2027_v32, %v1029_v20  ;;  %v1077_v24 = vmax.f32 %v1027_v4, 0.0  ;;  %2432 = vmatpush3.bf16.msra.mxu1 %v2564_v21 }
 0x56f   :  { %v1080_v31 = vmax.f32 %v1038_v17, 0.0  ;;  %2433 = vmatprep.subr.bf16.mxu1 %v2565_v36 }
 0x570   :  { %v1078_v25 = vmax.f32 %v1030_v15, 0.0 }
 0x571   :  { %v1092_v19 = vpack.c.bf16 %v1080_v31, %v1079_v28 }
 0x572   :  { %v1091_v54 = vpack.c.bf16 %v1078_v25, %v1077_v24  ;;  %v2361_v52 = vpop.f32.mrb[40].mxu0  ;;  %2434 = vmatpush3.bf16.msra.mxu1 %v2565_v36 }
 0x573   :  { %v1051_v57 = vadd.f32 %v2361_v52, %v2027_v32  ;;  %v1042_v50 = vpop.f32.mrb[41].mxu0  ;;  %2435 = vmatprep.subr.bf16.mxu1 %v2566_v29 }
 0x574   :  { %v1043_v55 = vadd.f32 %v2027_v32, %v1042_v50  ;;  %v2362_v56 = vpop.f32.mrb[42].mxu0  ;;  %2387 = vmatprep.mubr.bf16.mxu1 %v1091_v54 }
 0x575   :  { %v1054_v58 = vadd.f32 %v2362_v56, %v2027_v32  ;;  %v1045_v59 = vpop.f32.mrb[43].mxu0  ;;  %2388 = vmatmul.mubr.bf16.gmra.mrb[36].mxu1 %v1092_v19  ;;  %v1083_v46 = vmax.f32 %v1051_v57, 0.0 }
 0x576   :  { %v1046_v35 = vadd.f32 %v2027_v32, %v1045_v59  ;;  %v1081_v2 = vmax.f32 %v1043_v55, 0.0  ;;  %2436 = vmatpush3.bf16.msra.mxu1 %v2566_v29 }
 0x577   :  { %v1084_v8 = vmax.f32 %v1054_v58, 0.0  ;;  %2437 = vmatprep.subr.bf16.mxu1 %v2567_v30 }
 0x578   :  { %v1082_v7 = vmax.f32 %v1046_v35, 0.0 }
 0x579   :  { %v1094_v0 = vpack.c.bf16 %v1084_v8, %v1083_v46 }
 0x57a   :  { %v1093_v9 = vpack.c.bf16 %v1082_v7, %v1081_v2  ;;  %v2365_v5 = vpop.f32.mrb[44].mxu0  ;;  %2438 = vmatpush3.bf16.msra.mxu1 %v2567_v30 }
 0x57b   :  { %v1067_v12 = vadd.f32 %v2365_v5, %v2027_v32  ;;  %v1058_v3 = vpop.f32.mrb[45].mxu0 }
 0x57c   :  { %v1059_v47 = vadd.f32 %v2027_v32, %v1058_v3  ;;  %v2366_v48 = vpop.f32.mrb[46].mxu0  ;;  %2391 = vmatprep.mubr.bf16.mxu1 %v1093_v9 }
 0x57d   :  { %v1070_v22 = vadd.f32 %v2366_v48, %v2027_v32  ;;  %v1061_v13 = vpop.f32.mrb[47].mxu0  ;;  %2392 = vmatmul.mubr.bf16.gmra.mrb[40].mxu1 %v1094_v0  ;;  %v1087_v18 = vmax.f32 %v1067_v12, 0.0 }
 0x57e   :  { %v1062_v11 = vadd.f32 %v2027_v32, %v1061_v13  ;;  %v1085_v23 = vmax.f32 %v1059_v47, 0.0  ;;  %v2568_v32 = vld [vmem:[#allocation13 + $0x20] sm:$0xff]  }
 0x57f   :  { %v1088_v10 = vmax.f32 %v1070_v22, 0.0  ;;  %2439 = vmatprep.subr.bf16.mxu1 %v2568_v32 }
 0x580   :  { %v1086_v26 = vmax.f32 %v1062_v11, 0.0  ;;  %2440 = vmatpush3.bf16.msra.mxu1 %v2568_v32 }
 0x581   :  { %v1096_v27 = vpack.c.bf16 %v1088_v10, %v1087_v18  ;;  %2441 = vmatprep.subr.bf16.mxu1 %v2569_v37 }
 0x582   :  { %v1095_v34 = vpack.c.bf16 %v1086_v26, %v1085_v23 }
 0x584   :  { %2395 = vmatprep.mubr.bf16.mxu1 %v1095_v34  ;;  %2442 = vmatpush3.bf16.msra.mxu1 %v2569_v37 }
 0x585   :  { %2396 = vmatmul.mubr.bf16.gmra.mrb[44].mxu1 %v1096_v27 }
 0x640   :  { %v2385_v49 = vpop.f32.mrb[32].mxu1 }
 0x641   :  { %v1185_v51 = vpop.f32.mrb[33].mxu1  ;;  %v3287_v62 = vadd.f32 %v2385_v49, %v2036_v33  ;;  %v2571_v49 = vld [vmem:[#allocation13 + $0x38] sm:$0xff]  }
 0x642   :  { %v3283_v53 = vadd.f32 %v2036_v33, %v1185_v51  ;;  %v2386_v38 = vpop.f32.mrb[34].mxu1  ;;  %v2572_v51 = vld [vmem:[#allocation14] sm:$0xff]  }
 0x643   :  { %v3285_v60 = vadd.f32 %v2386_v38, %v2036_v33  ;;  %v1188_v61 = vpop.f32.mrb[35].mxu1  ;;  %v1250_v4 = vmax.f32 %v3287_v62, 0.0 }
 0x644   :  { %v3289_v63 = vadd.f32 %v2036_v33, %v1188_v61  ;;  %v1248_v1 = vmax.f32 %v3283_v53, 0.0 }
 0x645   :  { %v1251_v6 = vmax.f32 %v3285_v60, 0.0 }
 0x646   :  { %v1249_v14 = vmax.f32 %v3289_v63, 0.0 }
 0x647   :  { %v1299_v15 = vpack.c.bf16 %v1251_v6, %v1250_v4 }
 0x648   :  { %v1298_v16 = vpack.c.bf16 %v1249_v14, %v1248_v1  ;;  %v2389_v17 = vpop.f32.mrb[36].mxu1 }
 0x649   :  { %v1201_v20 = vpop.f32.mrb[37].mxu1  ;;  %v3307_v19 = vadd.f32 %v2389_v17, %v2036_v33 }
 0x64a   :  { %v3303_v28 = vadd.f32 %v2036_v33, %v1201_v20  ;;  %v2390_v31 = vpop.f32.mrb[38].mxu1  ;;  %2399 = vmatprep.subr.bf16.mxu0 %v1298_v16 }
 0x64b   :  { %v3305_v24 = vadd.f32 %v2390_v31, %v2036_v33  ;;  %v1204_v25 = vpop.f32.mrb[39].mxu1  ;;  %2400 = vmatpush3.bf16.msra.mxu0 %v1298_v16  ;;  %v1254_v55 = vmax.f32 %v3307_v19, 0.0 }
 0x64c   :  { %v3309_v54 = vadd.f32 %v2036_v33, %v1204_v25  ;;  %2401 = vmatprep.subr.bf16.mxu0 %v1299_v15  ;;  %v1252_v52 = vmax.f32 %v3303_v28, 0.0 }
 0x64d   :  { %v1255_v57 = vmax.f32 %v3305_v24, 0.0 }
 0x64e   :  { %v1253_v50 = vmax.f32 %v3309_v54, 0.0 }
 0x64f   :  { %2402 = vmatpush3.bf16.msra.mxu0 %v1299_v15  ;;  %v1301_v35 = vpack.c.bf16 %v1255_v57, %v1254_v55 }
 0x650   :  { %v1300_v56 = vpack.c.bf16 %v1253_v50, %v1252_v52  ;;  %v2393_v58 = vpop.f32.mrb[40].mxu1 }
 0x651   :  { %v1217_v59 = vpop.f32.mrb[41].mxu1  ;;  %v3327_v0 = vadd.f32 %v2393_v58, %v2036_v33 }
 0x652   :  { %v3323_v46 = vadd.f32 %v2036_v33, %v1217_v59  ;;  %v2394_v8 = vpop.f32.mrb[42].mxu1  ;;  %2403 = vmatprep.subr.bf16.mxu0 %v1300_v56 }
 0x653   :  { %v3325_v2 = vadd.f32 %v2394_v8, %v2036_v33  ;;  %v1220_v7 = vpop.f32.mrb[43].mxu1  ;;  %2404 = vmatpush3.bf16.msra.mxu0 %v1300_v56  ;;  %v1258_v47 = vmax.f32 %v3327_v0, 0.0 }
 0x654   :  { %v3329_v9 = vadd.f32 %v2036_v33, %v1220_v7  ;;  %2405 = vmatprep.subr.bf16.mxu0 %v1301_v35  ;;  %v1256_v5 = vmax.f32 %v3323_v46, 0.0 }
 0x655   :  { %v1259_v12 = vmax.f32 %v3325_v2, 0.0 }
 0x656   :  { %v1257_v3 = vmax.f32 %v3329_v9, 0.0 }
 0x657   :  { %2406 = vmatpush3.bf16.msra.mxu0 %v1301_v35  ;;  %v1303_v11 = vpack.c.bf16 %v1259_v12, %v1258_v47 }
 0x658   :  { %v1302_v48 = vpack.c.bf16 %v1257_v3, %v1256_v5  ;;  %v2397_v22 = vpop.f32.mrb[44].mxu1 }
 0x659   :  { %v1233_v13 = vpop.f32.mrb[45].mxu1  ;;  %v3347_v27 = vadd.f32 %v2397_v22, %v2036_v33  ;;  %v2579_v22 = vld [vmem:[#allocation14 + $0x38] sm:$0xff]  }
 0x65a   :  { %v3343_v18 = vadd.f32 %v2036_v33, %v1233_v13  ;;  %v2398_v10 = vpop.f32.mrb[46].mxu1  ;;  %2407 = vmatprep.subr.bf16.mxu0 %v1302_v48  ;;  %v2045_v13 = vld [vmem:[%s3645_s11] ss:$0 sm:$0xff] }
 0x65b   :  { %v3345_v23 = vadd.f32 %v2398_v10, %v2036_v33  ;;  %v1236_v26 = vpop.f32.mrb[47].mxu1  ;;  %2408 = vmatpush3.bf16.msra.mxu0 %v1302_v48  ;;  %v1262_v30 = vmax.f32 %v3347_v27, 0.0  ;;  %v2578_v48 = vld [vmem:[#allocation14 + $0x30] sm:$0xff]  }
 0x65c   :  { %v3349_v34 = vadd.f32 %v2036_v33, %v1236_v26  ;;  %2409 = vmatprep.subr.bf16.mxu0 %v1303_v11  ;;  %v1260_v21 = vmax.f32 %v3343_v18, 0.0  ;;  %v2570_v33 = vld [vmem:[#allocation13 + $0x30] sm:$0xff]  }
 0x65d   :  { %v1263_v36 = vmax.f32 %v3345_v23, 0.0  ;;  %2443 = vmatprep.subr.bf16.mxu1 %v2570_v33 }
 0x65e   :  { %v1261_v29 = vmax.f32 %v3349_v34, 0.0  ;;  %2444 = vmatpush3.bf16.msra.mxu1 %v2570_v33 }
 0x65f   :  { %2410 = vmatpush3.bf16.msra.mxu0 %v1303_v11  ;;  %v1305_v37 = vpack.c.bf16 %v1263_v36, %v1262_v30  ;;  %2445 = vmatprep.subr.bf16.mxu1 %v2571_v49 }
 0x660   :  { %v1304_v32 = vpack.c.bf16 %v1261_v29, %v1260_v21 }
 0x662   :  { %2411 = vmatprep.subr.bf16.mxu0 %v1304_v32  ;;  %2446 = vmatpush3.bf16.msra.mxu1 %v2571_v49 }
 0x663   :  { %2412 = vmatpush3.bf16.msra.mxu0 %v1304_v32  ;;  %2495 = vmatprep.subr.bf16.mxu1 %v2572_v51 }
 0x664   :  { %2413 = vmatprep.subr.bf16.mxu0 %v1305_v37 }
 0x667   :  { %2414 = vmatpush3.bf16.msra.mxu0 %v1305_v37 }
 0x668   :  { %2463 = vmatprep.subr.bf16.mxu0 %v2572_v51 }
 0x66a   :  { %2416 = vmatmul.mubr.bf16.vlgmr.msra.gmra.mrb[48].mxu0 %v3113_v39  ;;  %v2573_v39 = vld [vmem:[#allocation14 + $0x8] sm:$0xff]  }
 0x66b   :  { %2419 = vmatprep.mubr.bf16.mxu0 %v3116_v40  ;;  %2464 = vmatpush3.bf16.msra.mxu0 %v2572_v51  ;;  %v2574_v40 = vld [vmem:[#allocation14 + $0x10] sm:$0xff]  }
 0x66c   :  { %2465 = vmatprep.subr.bf16.mxu0 %v2573_v39 }
 0x66f   :  { %2466 = vmatpush3.bf16.msra.mxu0 %v2573_v39 }
 0x670   :  { %2467 = vmatprep.subr.bf16.mxu0 %v2574_v40 }
 0x672   :  { %2420 = vmatmul.mubr.bf16.gmra.mrb[52].mxu0 %v3119_v41  ;;  %v2575_v41 = vld [vmem:[#allocation14 + $0x18] sm:$0xff]  }
 0x673   :  { %2423 = vmatprep.mubr.bf16.mxu0 %v3122_v42  ;;  %2468 = vmatpush3.bf16.msra.mxu0 %v2574_v40  ;;  %v2576_v42 = vld [vmem:[#allocation14 + $0x20] sm:$0xff]  }
 0x674   :  { %2469 = vmatprep.subr.bf16.mxu0 %v2575_v41 }
 0x677   :  { %2470 = vmatpush3.bf16.msra.mxu0 %v2575_v41 }
 0x678   :  { %2471 = vmatprep.subr.bf16.mxu0 %v2576_v42 }
 0x67a   :  { %2424 = vmatmul.mubr.bf16.gmra.mrb[56].mxu0 %v3125_v43  ;;  %v2577_v43 = vld [vmem:[#allocation14 + $0x28] sm:$0xff]  }
 0x67b   :  { %2427 = vmatprep.mubr.bf16.mxu0 %v3128_v44  ;;  %2472 = vmatpush3.bf16.msra.mxu0 %v2576_v42 }
 0x67c   :  { %2473 = vmatprep.subr.bf16.mxu0 %v2577_v43 }
 0x67f   :  { %2474 = vmatpush3.bf16.msra.mxu0 %v2577_v43 }
 0x680   :  { %2475 = vmatprep.subr.bf16.mxu0 %v2578_v48 }
 0x682   :  { %2428 = vmatmul.mubr.bf16.gmra.mrb[60].mxu0 %v3131_v45 }
 0x683   :  { %2476 = vmatpush3.bf16.msra.mxu0 %v2578_v48 }
 0x684   :  { %2477 = vmatprep.subr.bf16.mxu0 %v2579_v22 }
 0x687   :  { %2478 = vmatpush3.bf16.msra.mxu0 %v2579_v22 }
 0x73d   :  { %v2417_v44 = vpop.f32.mrb[48].mxu0 }
 0x73e   :  { %v1340_v45 = vpop.f32.mrb[49].mxu0  ;;  %v1405_v61 = vadd.f32 %v2417_v44, %v1250_v4 }
 0x73f   :  { %v2418_v38 = vpop.f32.mrb[50].mxu0  ;;  %v1403_v20 = vadd.f32 %v1340_v45, %v1248_v1 }
 0x740   :  { %v1406_v16 = vadd.f32 %v2418_v38, %v1251_v6  ;;  %v1343_v17 = vpop.f32.mrb[51].mxu0 }
 0x741   :  { %v1404_v15 = vadd.f32 %v1343_v17, %v1249_v14 }
 0x742   :  { %v1420_v31 = vpack.c.bf16 %v1406_v16, %v1405_v61 }
 0x743   :  { %v1419_v25 = vpack.c.bf16 %v1404_v15, %v1403_v20 }
 0x745   :  { %v2421_v56 = vpop.f32.mrb[52].mxu0  ;;  %2447 = vmatprep.mubr.bf16.mxu1 %v1419_v25 }
 0x746   :  { %v1356_v58 = vpop.f32.mrb[53].mxu0  ;;  %2448 = vmatmul.mubr.bf16.vlgmr.msra.gmra.mrb[48].mxu1 %v1420_v31  ;;  %v1409_v62 = vadd.f32 %v2421_v56, %v1254_v55 }
 0x747   :  { %v2422_v59 = vpop.f32.mrb[54].mxu0  ;;  %2503 = vmatpush3.bf16.msra.mxu1 %v2572_v51  ;;  %v1407_v53 = vadd.f32 %v1356_v58, %v1252_v52 }
 0x748   :  { %v1410_v60 = vadd.f32 %v2422_v59, %v1255_v57  ;;  %v1359_v6 = vpop.f32.mrb[55].mxu0  ;;  %2496 = vmatprep.subr.bf16.mxu1 %v2573_v39 }
 0x749   :  { %v1408_v63 = vadd.f32 %v1359_v6, %v1253_v50 }
 0x74a   :  { %v1422_v1 = vpack.c.bf16 %v1410_v60, %v1409_v62 }
 0x74b   :  { %v1421_v14 = vpack.c.bf16 %v1408_v63, %v1407_v53  ;;  %2504 = vmatpush3.bf16.msra.mxu1 %v2573_v39 }
 0x74c   :  { %2497 = vmatprep.subr.bf16.mxu1 %v2574_v40 }
 0x74d   :  { %v2425_v4 = vpop.f32.mrb[56].mxu0  ;;  %2451 = vmatprep.mubr.bf16.mxu1 %v1421_v14 }
 0x74e   :  { %v1372_v35 = vpop.f32.mrb[57].mxu0  ;;  %2452 = vmatmul.mubr.bf16.gmra.mrb[52].mxu1 %v1422_v1  ;;  %v1413_v24 = vadd.f32 %v2425_v4, %v1258_v47 }
 0x74f   :  { %v2426_v19 = vpop.f32.mrb[58].mxu0  ;;  %2505 = vmatpush3.bf16.msra.mxu1 %v2574_v40  ;;  %v1411_v54 = vadd.f32 %v1372_v35, %v1256_v5 }
 0x750   :  { %v1414_v28 = vadd.f32 %v2426_v19, %v1259_v12  ;;  %v1375_v52 = vpop.f32.mrb[59].mxu0  ;;  %2498 = vmatprep.subr.bf16.mxu1 %v2575_v41 }
 0x751   :  { %v1412_v57 = vadd.f32 %v1375_v52, %v1257_v3 }
 0x752   :  { %v1424_v50 = vpack.c.bf16 %v1414_v28, %v1413_v24 }
 0x753   :  { %v1423_v55 = vpack.c.bf16 %v1412_v57, %v1411_v54  ;;  %2506 = vmatpush3.bf16.msra.mxu1 %v2575_v41 }
 0x754   :  { %2499 = vmatprep.subr.bf16.mxu1 %v2576_v42 }
 0x755   :  { %v2429_v8 = vpop.f32.mrb[60].mxu0  ;;  %2455 = vmatprep.mubr.bf16.mxu1 %v1423_v55 }
 0x756   :  { %v1388_v7 = vpop.f32.mrb[61].mxu0  ;;  %2456 = vmatmul.mubr.bf16.gmra.mrb[56].mxu1 %v1424_v50  ;;  %v1417_v2 = vadd.f32 %v2429_v8, %v1262_v30 }
 0x757   :  { %v2430_v0 = vpop.f32.mrb[62].mxu0  ;;  %2507 = vmatpush3.bf16.msra.mxu1 %v2576_v42  ;;  %v1415_v9 = vadd.f32 %v1388_v7, %v1260_v21 }
 0x758   :  { %v1418_v46 = vadd.f32 %v2430_v0, %v1263_v36  ;;  %v1391_v5 = vpop.f32.mrb[63].mxu0  ;;  %2500 = vmatprep.subr.bf16.mxu1 %v2577_v43 }
 0x759   :  { %v1416_v12 = vadd.f32 %v1391_v5, %v1261_v29  ;;  %v1753_v5 = vlaneseq }
 0x75a   :  { %v1426_v3 = vpack.c.bf16 %v1418_v46, %v1417_v2 }
 0x75b   :  { %v1425_v47 = vpack.c.bf16 %v1416_v12, %v1415_v9  ;;  %2508 = vmatpush3.bf16.msra.mxu1 %v2577_v43  ;;  %v3405_v9 = vand.u32 127, %v1753_v5  ;;  %v2054_v12 = vld [vmem:[%s3647_s13] ss:$0 sm:$0xff]  ;;  %s2866_s13 = smov [#allocation16]  }
 0x75c   :  { %2501 = vmatprep.subr.bf16.mxu1 %v2578_v48  ;;  %s1985_s1 = sshll.u32 %s2866_s13, 4  ;;  %s1986_s1 = int_to_ptr.vmem [resolvable:$true] %s1985_s1 }
 0x75d   :  { %2459 = vmatprep.mubr.bf16.mxu1 %v1425_v47  ;;  %vm1755_vm0 = vcmp.lt.s32.totalorder %v3405_v9, 7  ;;  %s2820_s6 = scalar_lea.vmem %s1986_s1, 2048  ;;  %p2825_p9 = scmp.lt.s32.totalorder %s1986_s1, %s1986_s1 }
 0x75e   :  { %2460 = vmatmul.mubr.bf16.gmra.mrb[60].mxu1 %v1426_v3  ;;  %p2821_p8 = scmp.ne.s32.totalorder %s1986_s1, %s2820_s6  ;;  %p2826_p10 = scmp.lt.s32.totalorder %s2820_s6, %s2820_s6 }
 0x75f   :  { %2509 = vmatpush3.bf16.msra.mxu1 %v2578_v48 }
 0x760   :  { %2502 = vmatprep.subr.bf16.mxu1 %v2579_v22  ;;  %p2827_p11 = por %p2826_p10, %p2825_p9 }
 0x762   :  { %p2828_p12 = pnand %p2827_p11, %p2821_p8 }
 0x763   :  { %2510 = vmatpush3.bf16.msra.mxu1 %v2579_v22 }
 0x819   :  { %v2449_v11 = vpop.f32.mrb[48].mxu1 }
 0x81a   :  { %v1524_v18 = vadd.f32 %v2449_v11, %v2045_v13  ;;  %v1515_v10 = vpop.f32.mrb[49].mxu1 }
 0x81b   :  { %v1516_v23 = vadd.f32 %v2045_v13, %v1515_v10  ;;  %v2450_v26 = vpop.f32.mrb[50].mxu1 }
 0x81c   :  { %v1527_v27 = vadd.f32 %v2450_v26, %v2045_v13  ;;  %v1518_v34 = vpop.f32.mrb[51].mxu1  ;;  %v1580_v36 = vmax.f32 %v1524_v18, 0.0 }
 0x81d   :  { %v1519_v21 = vadd.f32 %v2045_v13, %v1518_v34  ;;  %v1578_v30 = vmax.f32 %v1516_v23, 0.0 }
 0x81e   :  { %v1581_v29 = vmax.f32 %v1527_v27, 0.0 }
 0x81f   :  { %v1579_v32 = vmax.f32 %v1519_v21, 0.0 }
 0x820   :  { %v1595_v37 = vpack.c.bf16 %v1581_v29, %v1580_v36 }
 0x821   :  { %v1594_v33 = vpack.c.bf16 %v1579_v32, %v1578_v30  ;;  %v2453_v49 = vpop.f32.mrb[52].mxu1 }
 0x822   :  { %v1540_v51 = vadd.f32 %v2453_v49, %v2045_v13  ;;  %v1531_v39 = vpop.f32.mrb[53].mxu1 }
 0x823   :  { %v1532_v40 = vadd.f32 %v2045_v13, %v1531_v39  ;;  %v2454_v41 = vpop.f32.mrb[54].mxu1  ;;  %2479 = vmatprep.mubr.bf16.mxu0 %v1594_v33 }
 0x824   :  { %v1543_v42 = vadd.f32 %v2454_v41, %v2045_v13  ;;  %v1534_v43 = vpop.f32.mrb[55].mxu1  ;;  %2480 = vmatmul.mubr.bf16.vlgmr.msra.gmra.mrb[64].mxu0 %v1595_v37  ;;  %v1584_v45 = vmax.f32 %v1540_v51, 0.0 }
 0x825   :  { %v1535_v44 = vadd.f32 %v2045_v13, %v1534_v43  ;;  %v1582_v61 = vmax.f32 %v1532_v40, 0.0 }
 0x826   :  { %v1585_v38 = vmax.f32 %v1543_v42, 0.0 }
 0x827   :  { %v1583_v16 = vmax.f32 %v1535_v44, 0.0 }
 0x828   :  { %v1597_v17 = vpack.c.bf16 %v1585_v38, %v1584_v45 }
 0x829   :  { %v1596_v20 = vpack.c.bf16 %v1583_v16, %v1582_v61  ;;  %v2457_v15 = vpop.f32.mrb[56].mxu1 }
 0x82a   :  { %v1556_v31 = vadd.f32 %v2457_v15, %v2045_v13  ;;  %v1547_v25 = vpop.f32.mrb[57].mxu1 }
 0x82b   :  { %v1548_v56 = vadd.f32 %v2045_v13, %v1547_v25  ;;  %v2458_v58 = vpop.f32.mrb[58].mxu1  ;;  %2483 = vmatprep.mubr.bf16.mxu0 %v1596_v20 }
 0x82c   :  { %v1559_v59 = vadd.f32 %v2458_v58, %v2045_v13  ;;  %v1550_v62 = vpop.f32.mrb[59].mxu1  ;;  %2484 = vmatmul.mubr.bf16.gmra.mrb[68].mxu0 %v1597_v17  ;;  %v1588_v6 = vmax.f32 %v1556_v31, 0.0 }
 0x82d   :  { %v1551_v60 = vadd.f32 %v2045_v13, %v1550_v62  ;;  %v1586_v63 = vmax.f32 %v1548_v56, 0.0 }
 0x82e   :  { %v1589_v53 = vmax.f32 %v1559_v59, 0.0 }
 0x82f   :  { %v1587_v1 = vmax.f32 %v1551_v60, 0.0 }
 0x830   :  { %v1599_v14 = vpack.c.bf16 %v1589_v53, %v1588_v6 }
 0x831   :  { %v1598_v4 = vpack.c.bf16 %v1587_v1, %v1586_v63  ;;  %v2461_v35 = vpop.f32.mrb[60].mxu1 }
 0x832   :  { %v1572_v19 = vadd.f32 %v2461_v35, %v2045_v13  ;;  %v1563_v24 = vpop.f32.mrb[61].mxu1 }
 0x833   :  { %v1564_v28 = vadd.f32 %v2045_v13, %v1563_v24  ;;  %v2462_v52 = vpop.f32.mrb[62].mxu1  ;;  %2487 = vmatprep.mubr.bf16.mxu1 %v1598_v4 }
 0x834   :  { %v1575_v54 = vadd.f32 %v2462_v52, %v2045_v13  ;;  %v1566_v57 = vpop.f32.mrb[63].mxu1  ;;  %2488 = vmatmul.mubr.bf16.vlgmr.msra.gmra.mrb[64].mxu1 %v1599_v14  ;;  %v1592_v55 = vmax.f32 %v1572_v19, 0.0 }
 0x835   :  { %v1567_v50 = vadd.f32 %v2045_v13, %v1566_v57  ;;  %v1590_v7 = vmax.f32 %v1564_v28, 0.0 }
 0x836   :  { %v1593_v8 = vmax.f32 %v1575_v54, 0.0 }
 0x837   :  { %v1591_v0 = vmax.f32 %v1567_v50, 0.0 }
 0x838   :  { %v1601_v2 = vpack.c.bf16 %v1593_v8, %v1592_v55 }
 0x839   :  { %v1600_v46 = vpack.c.bf16 %v1591_v0, %v1590_v7 }
 0x83b   :  { %2491 = vmatprep.mubr.bf16.mxu1 %v1600_v46 }
 0x83c   :  { %2492 = vmatmul.mubr.bf16.gmra.mrb[68].mxu1 %v1601_v2 }
 0x8f7   :  { %v2481_v3 = vpop.f32.mrb[64].mxu0 }
 0x8f8   :  { %v1699_v47 = vadd.f32 %v2481_v3, %v2054_v12  ;;  %v1690_v48 = vpop.f32.mrb[65].mxu0 }
 0x8f9   :  { %v2482_v22 = vpop.f32.mrb[66].mxu0  ;;  %v1691_v13 = vadd.f32 %v2054_v12, %v1690_v48 }
 0x8fa   :  { %v1693_v11 = vpop.f32.mrb[67].mxu0  ;;  %v3413_v18 = vsel %vm1755_vm0, %v1699_v47, -inf  ;;  %v1702_v10 = vadd.f32 %v2482_v22, %v2054_v12 }
 0x8fb   :  { %1776 = vmax.xlane.f32.xlu1 %v3413_v18  ;;  %v3418_v23 = vsel %vm1755_vm0, %v1691_v13, -inf  ;;  %v1694_v21 = vadd.f32 %v2054_v12, %v1693_v11 }
 0x8fc   :  { %v3423_v29 = vsel %vm1755_vm0, %v1702_v10, -inf }
 0x8fd   :  { %v3428_v32 = vsel %vm1755_vm0, %v1694_v21, -inf }
 0x8ff   :  { %v2485_v26 = vpop.f32.mrb[68].mxu0  ;;  %1772 = vmax.xlane.f32.xlu1 %v3418_v23 }
 0x900   :  { %v1706_v27 = vpop.f32.mrb[69].mxu0  ;;  %v1715_v30 = vadd.f32 %v2485_v26, %v2054_v12 }
 0x901   :  { %v2486_v34 = vpop.f32.mrb[70].mxu0  ;;  %v1707_v39 = vadd.f32 %v2054_v12, %v1706_v27 }
 0x902   :  { %v1709_v36 = vpop.f32.mrb[71].mxu0  ;;  %v3433_v41 = vsel %vm1755_vm0, %v1715_v30, -inf  ;;  %v1718_v43 = vadd.f32 %v2486_v34, %v2054_v12 }
 0x903   :  { %1778 = vmax.xlane.f32.xlu1 %v3423_v29  ;;  %v3443_v44 = vsel %vm1755_vm0, %v1707_v39, -inf  ;;  %v1710_v16 = vadd.f32 %v2054_v12, %v1709_v36 }
 0x904   :  { %v3448_v20 = vsel %vm1755_vm0, %v1718_v43, -inf }
 0x905   :  { %v3458_v58 = vsel %vm1755_vm0, %v1710_v16, -inf }
 0x907   :  { %1774 = vmax.xlane.f32.xlu1 %v3428_v32  ;;  %v2489_v37 = vpop.f32.mrb[64].mxu1 }
 0x908   :  { %v1722_v33 = vpop.f32.mrb[65].mxu1  ;;  %v1731_v56 = vadd.f32 %v2489_v37, %v2054_v12 }
 0x909   :  { %v1723_v49 = vadd.f32 %v2054_v12, %v1722_v33  ;;  %v2490_v51 = vpop.f32.mrb[66].mxu1 }
 0x90a   :  { %v1725_v40 = vpop.f32.mrb[67].mxu1  ;;  %v1734_v62 = vadd.f32 %v2490_v51, %v2054_v12  ;;  %v3468_v60 = vsel %vm1755_vm0, %v1731_v56, -inf }
 0x90b   :  { %1784 = vmax.xlane.f32.xlu1 %v3433_v41  ;;  %v3438_v42 = vsel %vm1755_vm0, %v1723_v49, -inf  ;;  %v1726_v6 = vadd.f32 %v2054_v12, %v1725_v40 }
 0x90c   :  { %1788 = vmax.xlane.f32.xlu0 %v3438_v42  ;;  %v3473_v53 = vsel %vm1755_vm0, %v1734_v62, -inf }
 0x90d   :  { %v3478_v1 = vsel %vm1755_vm0, %v1726_v6, -inf }
 0x90f   :  { %1780 = vmax.xlane.f32.xlu1 %v3443_v44  ;;  %v2493_v45 = vpop.f32.mrb[68].mxu1 }
 0x910   :  { %v1738_v38 = vpop.f32.mrb[69].mxu1  ;;  %v1747_v14 = vadd.f32 %v2493_v45, %v2054_v12 }
 0x911   :  { %v2494_v61 = vpop.f32.mrb[70].mxu1  ;;  %v1739_v63 = vadd.f32 %v2054_v12, %v1738_v38 }
 0x912   :  { %v1741_v17 = vpop.f32.mrb[71].mxu1  ;;  %v1750_v31 = vadd.f32 %v2494_v61, %v2054_v12  ;;  %v3488_v35 = vsel %vm1755_vm0, %v1747_v14, -inf }
 0x913   :  { %v1742_v15 = vadd.f32 %v2054_v12, %v1741_v17  ;;  %1786 = vmax.xlane.f32.xlu1 %v3448_v20  ;;  %v3483_v4 = vsel %vm1755_vm0, %v1739_v63, -inf }
 0x914   :  { %v3463_v59 = vsel %vm1755_vm0, %v1750_v31, -inf }
 0x915   :  { %v3453_v25 = vsel %vm1755_vm0, %v1742_v15, -inf }
 0x916   :  { %1798 = vmax.xlane.f32.xlu0 %v3453_v25 }
 0x917   :  { %1782 = vmax.xlane.f32.xlu1 %v3458_v58 }
 0x91a   :  { %1802 = vmax.xlane.f32.xlu0 %v3463_v59 }
 0x91b   :  { %1792 = vmax.xlane.f32.xlu1 %v3468_v60 }
 0x91f   :  { %1794 = vmax.xlane.f32.xlu1 %v3473_v53 }
 0x923   :  { %1790 = vmax.xlane.f32.xlu1 %v3478_v1 }
 0x927   :  { %1796 = vmax.xlane.f32.xlu1 %v3483_v4 }
 0x92b   :  { %1800 = vmax.xlane.f32.xlu1 %v3488_v35 }
 0x988   :  { %v3491_v19 = vpop.xlane.xlu1 %1776 }
 0x989   :  { %v1806_v24 = vsub.f32 %v3413_v18, %v3491_v19 }
 0x98b   :  { %v1824_v28 = vmul.f32 1.442695, %v1806_v24 }
 0x98c   :  { %v3495_v52 = vpop.xlane.xlu1 %1772 }
 0x98d   :  { %2580 = vpow2.f32 %v1824_v28  ;;  %v1804_v54 = vsub.f32 %v3418_v23, %v3495_v52 }
 0x98f   :  { %v1820_v57 = vmul.f32 1.442695, %v1804_v54 }
 0x990   :  { %v3499_v50 = vpop.xlane.xlu1 %1778 }
 0x991   :  { %2582 = vpow2.f32 %v1820_v57  ;;  %v1807_v55 = vsub.f32 %v3423_v29, %v3499_v50 }
 0x993   :  { %v1826_v8 = vmul.f32 1.442695, %v1807_v55 }
 0x994   :  { %v3503_v7 = vpop.xlane.xlu1 %1774 }
 0x995   :  { %2584 = vpow2.f32 %v1826_v8  ;;  %v1805_v0 = vsub.f32 %v3428_v32, %v3503_v7 }
 0x997   :  { %v2581_v2 = vpop.eup %2580  ;;  %v1822_v46 = vmul.f32 1.442695, %v1805_v0 }
 0x998   :  { %v3507_v5 = vpop.xlane.xlu1 %1784  ;;  %1856 = vadd.xlane.f32.xlu1 %v2581_v2 }
 0x999   :  { %2586 = vpow2.f32 %v1822_v46  ;;  %v1810_v12 = vsub.f32 %v3433_v41, %v3507_v5  ;;  %v3521_v36 = vpop.xlane.xlu0 %1788 }
 0x99a   :  { %v1812_v49 = vsub.f32 %v3438_v42, %v3521_v36 }
 0x99b   :  { %v2583_v3 = vpop.eup %2582  ;;  %v1832_v47 = vmul.f32 1.442695, %v1810_v12 }
 0x99c   :  { %v3511_v48 = vpop.xlane.xlu1 %1780  ;;  %1852 = vadd.xlane.f32.xlu1 %v2583_v3  ;;  %v1836_v38 = vmul.f32 1.442695, %v1812_v49 }
 0x99d   :  { %2588 = vpow2.f32 %v1832_v47  ;;  %v1808_v22 = vsub.f32 %v3443_v44, %v3511_v48 }
 0x99f   :  { %v2585_v13 = vpop.eup %2584  ;;  %v1828_v11 = vmul.f32 1.442695, %v1808_v22 }
 0x9a0   :  { %v3515_v10 = vpop.xlane.xlu1 %1786  ;;  %1858 = vadd.xlane.f32.xlu0 %v2585_v13 }
 0x9a1   :  { %2590 = vpow2.f32 %v1828_v11  ;;  %v1811_v26 = vsub.f32 %v3448_v20, %v3515_v10 }
 0x9a3   :  { %v2587_v27 = vpop.eup %2586  ;;  %v1834_v34 = vmul.f32 1.442695, %v1811_v26  ;;  %v3531_v43 = vpop.xlane.xlu0 %1798 }
 0x9a4   :  { %v3519_v21 = vpop.xlane.xlu1 %1782  ;;  %1854 = vadd.xlane.f32.xlu0 %v2587_v27  ;;  %v1817_v31 = vsub.f32 %v3453_v25, %v3531_v43 }
 0x9a5   :  { %2592 = vpow2.f32 %v1834_v34  ;;  %v1809_v30 = vsub.f32 %v3458_v58, %v3519_v21 }
 0x9a6   :  { %v1846_v24 = vmul.f32 1.442695, %v1817_v31 }
 0x9a7   :  { %v2589_v37 = vpop.eup %2588  ;;  %v1830_v33 = vmul.f32 1.442695, %v1809_v30  ;;  %v3541_v62 = vpop.xlane.xlu0 %1802 }
 0x9a8   :  { %v3527_v51 = vpop.xlane.xlu1 %1792  ;;  %1864 = vadd.xlane.f32.xlu1 %v2589_v37  ;;  %v1819_v28 = vsub.f32 %v3463_v59, %v3541_v62 }
 0x9a9   :  { %2594 = vpow2.f32 %v1830_v33  ;;  %v1814_v39 = vsub.f32 %v3468_v60, %v3527_v51 }
 0x9aa   :  { %v1850_v0 = vmul.f32 1.442695, %v1819_v28 }
 0x9ab   :  { %v2591_v40 = vpop.eup %2590  ;;  %v1840_v45 = vmul.f32 1.442695, %v1814_v39 }
 0x9ac   :  { %v3533_v61 = vpop.xlane.xlu1 %1794  ;;  %1860 = vadd.xlane.f32.xlu1 %v2591_v40 }
 0x9ad   :  { %2596 = vpow2.f32 %v1840_v45  ;;  %v1815_v16 = vsub.f32 %v3473_v53, %v3533_v61 }
 0x9ae   :  { %2598 = vpow2.f32 %v1836_v38 }
 0x9af   :  { %v2593_v17 = vpop.eup %2592  ;;  %v1842_v15 = vmul.f32 1.442695, %v1815_v16 }
 0x9b0   :  { %v3539_v56 = vpop.xlane.xlu1 %1790  ;;  %1866 = vadd.xlane.f32.xlu0 %v2593_v17 }
 0x9b1   :  { %2600 = vpow2.f32 %v1842_v15  ;;  %v1813_v6 = vsub.f32 %v3478_v1, %v3539_v56 }
 0x9b3   :  { %v2595_v63 = vpop.eup %2594  ;;  %v1838_v14 = vmul.f32 1.442695, %v1813_v6 }
 0x9b4   :  { %1862 = vadd.xlane.f32.xlu0 %v2595_v63  ;;  %v3547_v54 = vpop.xlane.xlu1 %1796 }
 0x9b5   :  { %2602 = vpow2.f32 %v1838_v14  ;;  %v1816_v57 = vsub.f32 %v3483_v4, %v3547_v54 }
 0x9b6   :  { %2604 = vpow2.f32 %v1846_v24 }
 0x9b7   :  { %v2597_v55 = vpop.eup %2596  ;;  %v1844_v8 = vmul.f32 1.442695, %v1816_v57 }
 0x9b8   :  { %1872 = vadd.xlane.f32.xlu1 %v2597_v55  ;;  %v3551_v2 = vpop.xlane.xlu1 %1800  ;;  %v2599_v12 = vpop.eup %2598 }
 0x9b9   :  { %2606 = vpow2.f32 %v1844_v8  ;;  %v1818_v46 = vsub.f32 %v3488_v35, %v3551_v2 }
 0x9ba   :  { %2608 = vpow2.f32 %v1850_v0 }
 0x9bb   :  { %v2601_v3 = vpop.eup %2600  ;;  %v1848_v47 = vmul.f32 1.442695, %v1818_v46 }
 0x9bc   :  { %1874 = vadd.xlane.f32.xlu0 %v2601_v3  ;;  %1868 = vadd.xlane.f32.xlu1 %v2599_v12 }
 0x9bd   :  { %2610 = vpow2.f32 %v1848_v47 }
 0x9bf   :  { %v2603_v22 = vpop.eup %2602 }
 0x9c0   :  { %1870 = vadd.xlane.f32.xlu0 %v2603_v22  ;;  %v2605_v13 = vpop.eup %2604 }
 0x9c3   :  { %v2607_v11 = vpop.eup %2606 }
 0x9c4   :  { %1878 = vadd.xlane.f32.xlu0 %v2605_v13  ;;  %1876 = vadd.xlane.f32.xlu1 %v2607_v11  ;;  %v2609_v26 = vpop.eup %2608 }
 0x9c7   :  { %v2611_v27 = vpop.eup %2610 }
 0x9c8   :  { %1882 = vadd.xlane.f32.xlu0 %v2609_v26  ;;  %1880 = vadd.xlane.f32.xlu1 %v2611_v27 }
 0xa25   :  { %v1857_v34 = vpop.xlane.xlu1 %1856 }
 0xa26   :  { %2612 = vlog2.f32 %v1857_v34 }
 0xa29   :  { %v1853_v30 = vpop.xlane.xlu1 %1852 }
 0xa2a   :  { %2614 = vlog2.f32 %v1853_v30 }
 0xa2d   :  { %v1859_v37 = vpop.xlane.xlu0 %1858 }
 0xa2e   :  { %2616 = vlog2.f32 %v1859_v37 }
 0xa30   :  { %v2613_v33 = vpop.eup %2612 }
 0xa31   :  { %v1889_v49 = vmul.f32 0.6931472, %v2613_v33  ;;  %v1855_v39 = vpop.xlane.xlu0 %1854 }
 0xa32   :  { %2618 = vlog2.f32 %v1855_v39 }
 0xa33   :  { %v1918_v40 = vadd.f32 %v1889_v49, %v3491_v19 }
 0xa34   :  { %v2615_v45 = vpop.eup %2614 }
 0xa35   :  { %v1934_v38 = vsub.f32 %v3413_v18, %v1918_v40  ;;  %v1885_v16 = vmul.f32 0.6931472, %v2615_v45  ;;  %v1865_v17 = vpop.xlane.xlu1 %1864 }
 0xa36   :  { %2620 = vlog2.f32 %v1865_v17 }
 0xa37   :  { %v1950_v15 = vsel %vm1755_vm0, %v1934_v38, 0.0  ;;  %v1916_v31 = vadd.f32 %v1885_v16, %v3495_v52 }
 0xa38   :  { %v2617_v6 = vpop.eup %2616  ;;  %1966 = vst [vmem:[#allocation16 + $0x10] sm:$0xff] %v1950_v15 }
 0xa39   :  { %v1932_v63 = vsub.f32 %v3418_v23, %v1916_v31  ;;  %v1891_v14 = vmul.f32 0.6931472, %v2617_v6  ;;  %v1861_v24 = vpop.xlane.xlu1 %1860 }
 0xa3a   :  { %2622 = vlog2.f32 %v1861_v24 }
 0xa3b   :  { %v1948_v19 = vsel %vm1755_vm0, %v1932_v63, 0.0  ;;  %v1919_v18 = vadd.f32 %v1891_v14, %v3499_v50 }
 0xa3c   :  { %v2619_v28 = vpop.eup %2618  ;;  %1964 = vst [vmem:[#allocation16] sm:$0xff] %v1948_v19 }
 0xa3d   :  { %v1935_v57 = vsub.f32 %v3423_v29, %v1919_v18  ;;  %v1887_v55 = vmul.f32 0.6931472, %v2619_v28  ;;  %v1867_v8 = vpop.xlane.xlu0 %1866 }
 0xa3e   :  { %2624 = vlog2.f32 %v1867_v8 }
 0xa3f   :  { %v1951_v52 = vsel %vm1755_vm0, %v1935_v57, 0.0  ;;  %v1917_v23 = vadd.f32 %v1887_v55, %v3503_v7 }
 0xa40   :  { %v2621_v0 = vpop.eup %2620  ;;  %1967 = vst [vmem:[#allocation16 + $0x18] sm:$0xff] %v1951_v52 }
 0xa41   :  { %v1933_v46 = vsub.f32 %v3428_v32, %v1917_v23  ;;  %v1897_v12 = vmul.f32 0.6931472, %v2621_v0  ;;  %v1863_v3 = vpop.xlane.xlu0 %1862 }
 0xa42   :  { %2626 = vlog2.f32 %v1863_v3 }
 0xa43   :  { %v1949_v50 = vsel %vm1755_vm0, %v1933_v46, 0.0  ;;  %v1922_v29 = vadd.f32 %v1897_v12, %v3507_v5 }
 0xa44   :  { %v2623_v47 = vpop.eup %2622  ;;  %1965 = vst [vmem:[#allocation16 + $0x8] sm:$0xff] %v1949_v50 }
 0xa45   :  { %v1938_v22 = vsub.f32 %v3433_v41, %v1922_v29  ;;  %v1893_v13 = vmul.f32 0.6931472, %v2623_v47  ;;  %v1873_v11 = vpop.xlane.xlu1 %1872 }
 0xa46   :  { %2628 = vlog2.f32 %v1873_v11 }
 0xa47   :  { %v1954_v7 = vsel %vm1755_vm0, %v1938_v22, 0.0  ;;  %v1920_v32 = vadd.f32 %v1893_v13, %v3511_v48 }
 0xa48   :  { %v2625_v26 = vpop.eup %2624  ;;  %1970 = vst [vmem:[#allocation16 + $0x30] sm:$0xff] %v1954_v7 }
 0xa49   :  { %v1936_v27 = vsub.f32 %v3443_v44, %v1920_v32  ;;  %v1899_v34 = vmul.f32 0.6931472, %v2625_v26  ;;  %v1875_v30 = vpop.xlane.xlu0 %1874  ;;  %v1869_v37 = vpop.xlane.xlu1 %1868 }
 0xa4a   :  { %2630 = vlog2.f32 %v1875_v30 }
 0xa4b   :  { %v1952_v5 = vsel %vm1755_vm0, %v1936_v27, 0.0  ;;  %v1923_v41 = vadd.f32 %v1899_v34, %v3515_v10  ;;  %2632 = vlog2.f32 %v1869_v37 }
 0xa4c   :  { %v2627_v33 = vpop.eup %2626  ;;  %1968 = vst [vmem:[#allocation16 + $0x20] sm:$0xff] %v1952_v5 }
 0xa4d   :  { %v1939_v49 = vsub.f32 %v3448_v20, %v1923_v41  ;;  %v1895_v39 = vmul.f32 0.6931472, %v2627_v33  ;;  %v1871_v48 = vpop.xlane.xlu0 %1870 }
 0xa4e   :  { %2634 = vlog2.f32 %v1871_v48 }
 0xa4f   :  { %v1955_v44 = vsel %vm1755_vm0, %v1939_v49, 0.0  ;;  %v1921_v40 = vadd.f32 %v1895_v39, %v3519_v21 }
 0xa50   :  { %v2629_v45 = vpop.eup %2628  ;;  %1971 = vst [vmem:[#allocation16 + $0x38] sm:$0xff] %v1955_v44 }
 0xa51   :  { %v1937_v38 = vsub.f32 %v3458_v58, %v1921_v40  ;;  %v1905_v16 = vmul.f32 0.6931472, %v2629_v45  ;;  %v1879_v17 = vpop.xlane.xlu0 %1878  ;;  %v1877_v10 = vpop.xlane.xlu1 %1876 }
 0xa52   :  { %2636 = vlog2.f32 %v1879_v17 }
 0xa53   :  { %v1953_v15 = vsel %vm1755_vm0, %v1937_v38, 0.0  ;;  %v1926_v20 = vadd.f32 %v1905_v16, %v3527_v51  ;;  %2638 = vlog2.f32 %v1877_v10 }
 0xa54   :  { %v2631_v31 = vpop.eup %2630  ;;  %1969 = vst [vmem:[#allocation16 + $0x28] sm:$0xff] %v1953_v15 }
 0xa55   :  { %v2633_v6 = vpop.eup %2632  ;;  %v1942_v63 = vsub.f32 %v3468_v60, %v1926_v20  ;;  %v1907_v21 = vmul.f32 0.6931472, %v2631_v31  ;;  %v1883_v14 = vpop.xlane.xlu0 %1882 }
 0xa56   :  { %v1881_v24 = vpop.xlane.xlu1 %1880  ;;  %v1901_v19 = vmul.f32 0.6931472, %v2633_v6  ;;  %2640 = vlog2.f32 %v1883_v14 }
 0xa57   :  { %v1958_v58 = vsel %vm1755_vm0, %v1942_v63, 0.0  ;;  %v1927_v18 = vadd.f32 %v1907_v21, %v3533_v61  ;;  %2642 = vlog2.f32 %v1881_v24 }
 0xa58   :  { %v2635_v28 = vpop.eup %2634  ;;  %1974 = vst [vmem:[#allocation16 + $0x50] sm:$0xff] %v1958_v58  ;;  %v1924_v51 = vadd.f32 %v1901_v19, %v3521_v36 }
 0xa59   :  { %v1943_v57 = vsub.f32 %v3473_v53, %v1927_v18  ;;  %v1903_v55 = vmul.f32 0.6931472, %v2635_v28 }
 0xa5a   :  { %v1940_v60 = vsub.f32 %v3438_v42, %v1924_v51 }
 0xa5b   :  { %v1959_v8 = vsel %vm1755_vm0, %v1943_v57, 0.0  ;;  %v1925_v52 = vadd.f32 %v1903_v55, %v3539_v56 }
 0xa5c   :  { %v2637_v23 = vpop.eup %2636  ;;  %1975 = vst [vmem:[#allocation16 + $0x58] sm:$0xff] %v1959_v8  ;;  %v1956_v61 = vsel %vm1755_vm0, %v1940_v60, 0.0 }
 0xa5d   :  { %v2639_v0 = vpop.eup %2638  ;;  %1972 = vst [vmem:[#allocation16 + $0x40] sm:$0xff] %v1956_v61  ;;  %v1941_v46 = vsub.f32 %v3478_v1, %v1925_v52  ;;  %v1911_v36 = vmul.f32 0.6931472, %v2637_v23 }
 0xa5e   :  { %v1909_v12 = vmul.f32 0.6931472, %v2639_v0 }
 0xa5f   :  { %v1957_v53 = vsel %vm1755_vm0, %v1941_v46, 0.0  ;;  %v1929_v42 = vadd.f32 %v1911_v36, %v3531_v43 }
 0xa60   :  { %v2641_v3 = vpop.eup %2640  ;;  %1973 = vst [vmem:[#allocation16 + $0x48] sm:$0xff] %v1957_v53  ;;  %v1928_v56 = vadd.f32 %v1909_v12, %v3547_v54 }
 0xa61   :  { %v2643_v50 = vpop.eup %2642  ;;  %v1945_v29 = vsub.f32 %v3453_v25, %v1929_v42  ;;  %v1915_v47 = vmul.f32 0.6931472, %v2641_v3 }
 0xa62   :  { %v1944_v22 = vsub.f32 %v3483_v4, %v1928_v56  ;;  %v1913_v13 = vmul.f32 0.6931472, %v2643_v50 }
 0xa63   :  { %v1961_v1 = vsel %vm1755_vm0, %v1945_v29, 0.0  ;;  %v1931_v11 = vadd.f32 %v1915_v47, %v3541_v62 }
 0xa64   :  { %1977 = vst [vmem:[#allocation16 + $0x68] sm:$0xff] %v1961_v1  ;;  %v1960_v43 = vsel %vm1755_vm0, %v1944_v22, 0.0  ;;  %v1930_v7 = vadd.f32 %v1913_v13, %v3551_v2 }
 0xa65   :  { %1976 = vst [vmem:[#allocation16 + $0x60] sm:$0xff] %v1960_v43  ;;  %v1947_v25 = vsub.f32 %v3463_v59, %v1931_v11 }
 0xa66   :  { %v1946_v54 = vsub.f32 %v3488_v35, %v1930_v7 }
 0xa67   :  { %v1963_v4 = vsel %vm1755_vm0, %v1947_v25, 0.0 }
 0xa68   :  { %1979 = vst [vmem:[#allocation16 + $0x78] sm:$0xff] %v1963_v4  ;;  %v1962_v62 = vsel %vm1755_vm0, %v1946_v54, 0.0 }
 0xa69   :  { %1978 = vst [vmem:[#allocation16 + $0x70] sm:$0xff] %v1962_v62 }
 0xa6a   :  { %2831 = shalt.err (!%p2828_p12)
}
 0xa6b   :  { %s2832_s16 = scalar_lea.hbm %s3648_s14, 2048 }
 0xa6c   :  { %p2833_p13 = scmp.ne.s32.totalorder %s3648_s14, %s2832_s16  ;;  %p2836_p0 = scmp.lt.u32.totalorder %s2832_s16, %s3648_s14 }
 0xa6e   :  { %p2838_p1 = pnand %p2836_p0, %p2833_p13 }
 0xa70   :  { %2841 = shalt.err (!%p2838_p1)
}
 0xa71   :  { %1991 = dma.vmem_to_hbm [thread:$0]  %s1986_s1, 2048, %s3648_s14, [#allocation4], %s2855_s23, %s2855_s23, %s2856_s24  }
 0xa72   :  { %2852 = dma.done.wait [#allocation4], 2048  }
 0xa73   :  { %2853 = vsyncadd [#allocation4], 4294965248 }
 0xa74   :  { %1995 = vsyncpa [#allocation3], 1 }
 0xa75   :  { %1996 = vsyncpa [#allocation6], 1 }
 0xa76   :  { %1997 = vsyncpa [#allocation9], 1 }
 0xa77   :  { %1998 = vsyncpa [#allocation12], 1 }
 0xa78   :  { %1999 = vsyncpa [#allocation15], 1 }
 0xa79   :  { %2000 = vsyncpa [#allocation4], 1 }

</bundles_post_ra>
